<compile_context>
chip_gen: v5e
topology: v5e:2x2
jax: 0.10.0
libtpu: 0.0.40
codegen_flags: <defaults>
</compile_context>

<pallas_src>
import functools

import jax
import jax.numpy as jnp
import numpy as np
from jax.experimental import pallas as pl
from jax.experimental.pallas import tpu as pltpu


# ----------------------------------------------------------------------------
# helpers
# ----------------------------------------------------------------------------
def _round_up(x, m):
    return ((x + m - 1) // m) * m


def _vmem_limit(estimate_bytes):
    # floor at the v6e/v7x scoped default (safe everywhere), cap well below
    # v7x's 64 MiB physical VMEM.
    return int(min(48 << 20, max(32 << 20, estimate_bytes)))


def _pad_gate_cols(w, h, hp):
    """Pad the last axis from (..., 3h) to (..., 3hp), per gate slab (r|z|n)."""
    if hp == h:
        return w
    pads = [(0, 0)] * (w.ndim - 1) + [(0, hp - h)]
    parts = [jnp.pad(w[..., g * h:(g + 1) * h], pads) for g in range(3)]
    return jnp.concatenate(parts, axis=-1)


# ----------------------------------------------------------------------------
# Pallas kernel 1: dense (x @ W + b), tiled over rows AND columns.
# Used for the final fully-connected layer (lane-dense, weight streamed).
# ----------------------------------------------------------------------------
def dense_kernel(x_ref, w_ref, b_ref, out_ref):
    out_ref[...] = (
        jnp.dot(x_ref[...], w_ref[...], preferred_element_type=jnp.float32)
        + b_ref[...]
    ).astype(out_ref.dtype)


def pallas_dense(x, w, b, *, row_tile=512, col_tile=1024):
    """x: (R, K), w: (K, N) bf16, b: (N,) f32 -> (R, N) f32.

    Rows and columns are both tiled ('parallel','parallel' -> megacore friendly
    on v7x); the weight is streamed in lane-dense (K, col_tile) blocks so it is
    never fully resident in VMEM.
    """
    R, K = x.shape
    N = w.shape[1]
    rt = min(row_tile, R)
    Rp = _round_up(R, rt)
    ct = min(col_tile, N)
    assert N % ct == 0, "pad N to a multiple of col_tile before calling"
    if Rp != R:
        x = jnp.pad(x, ((0, Rp - R), (0, 0)))

    est = 2 * (rt * K * x.dtype.itemsize + K * ct * w.dtype.itemsize
               + ct * 4 + rt * ct * 4) + (4 << 20)
    out = pl.pallas_call(
        dense_kernel,
        out_shape=jax.ShapeDtypeStruct((Rp, N), jnp.float32),
        grid_spec=pltpu.PrefetchScalarGridSpec(
            num_scalar_prefetch=0,
            grid=(Rp // rt, N // ct),
            in_specs=[
                pl.BlockSpec((rt, K), lambda r, c: (r, 0)),
                pl.BlockSpec((K, ct), lambda r, c: (0, c)),
                pl.BlockSpec((1, ct), lambda r, c: (0, c)),
            ],
            out_specs=pl.BlockSpec((rt, ct), lambda r, c: (r, c)),
        ),
        compiler_params=pltpu.CompilerParams(
            dimension_semantics=("parallel", "parallel"),
            vmem_limit_bytes=_vmem_limit(est),
        ),
    )(x, w, b.reshape(1, N))
    return out[:R]


# ----------------------------------------------------------------------------
# Pallas kernel 2: fused GRU (input->gates matmul + recurrence) over time
# blocks, with a batch-parallel leading grid axis.
#   x_ref    : (Tc, bt, D)  bf16  raw inputs for this (batch, time) block
#   w_ih_ref : (D, 3Hp)     bf16  input->gates weights (r|z|n)
#   b_gi_ref : (1, 3Hp)     f32   b_ih + [b_hr | b_hz | 0]   (folded)
#   whh_ref  : (Hp, 3Hp)    bf16  hidden->gates weights
#   b_hn_ref : (1, Hp)      f32   b_hn (must stay inside r*(W_hn h + b_hn))
#   hT_ref   : (bt, Hp)     bf16  final hidden state (written on last block)
#   gi_scr   : (Tc*bt, 3Hp) f32   VMEM scratch holding the fused gi block
#   h_scr    : (bt, Hp)     f32   VMEM scratch carrying h across time blocks
# ----------------------------------------------------------------------------
def gru_recurrence_kernel(seq_len, hidden_p, unroll,
                          x_ref, w_ih_ref, b_gi_ref, whh_ref, b_hn_ref,
                          hT_ref, gi_scr, h_scr):
    t_blk = pl.program_id(1)
    n_tblk = pl.num_programs(1)
    tc, bt, d = x_ref.shape
    hp = hidden_p

    @pl.when(t_blk == 0)
    def _():
        h_scr[...] = jnp.zeros_like(h_scr)

    # (1) fused input->gates matmul for the whole time block: one bf16 MXU
    # matmul with f32 accumulation, result stays in VMEM (no HBM round trip).
    x_blk = x_ref[...].reshape(tc * bt, d)                      # bf16
    gi_scr[...] = (
        jnp.dot(x_blk, w_ih_ref[...], preferred_element_type=jnp.float32)
        + b_gi_ref[...]
    )

    whh = whh_ref[...]                                          # bf16, hoisted
    b_hn = jnp.broadcast_to(b_hn_ref[...], (bt, hp))            # hoisted (f32)

    def make_step(with_mask):
        def step(i, h):
            row = pl.multiple_of(i * bt, bt)
            gi_t = gi_scr[pl.ds(row, bt), :]                    # (bt, 3Hp) f32
            gh = jnp.dot(h.astype(whh.dtype), whh,
                         preferred_element_type=jnp.float32)    # (bt, 3Hp) f32
            r = jax.nn.sigmoid(gi_t[:, :hp] + gh[:, :hp])
            z = jax.nn.sigmoid(gi_t[:, hp:2 * hp] + gh[:, hp:2 * hp])
            n = jnp.tanh(gi_t[:, 2 * hp:] + r * (gh[:, 2 * hp:] + b_hn))
            h_new = (1.0 - z) * n + z * h
            if with_mask:
                valid = (t_blk * tc + i) < seq_len
                h_new = jnp.where(valid, h_new, h)
            return h_new
        return step

    def run(with_mask):
        return jax.lax.fori_loop(0, tc, make_step(with_mask), h_scr[...],
                                 unroll=unroll)

    if seq_len % tc == 0:
        # no padded timesteps anywhere -> no per-step select at all
        h_scr[...] = run(False)
    else:
        # only the last time block can contain padded timesteps
        @pl.when(t_blk < n_tblk - 1)
        def _():
            h_scr[...] = run(False)

        @pl.when(t_blk == n_tblk - 1)
        def _():
            h_scr[...] = run(True)

    @pl.when(t_blk == n_tblk - 1)
    def _():
        hT_ref[...] = h_scr[...].astype(hT_ref.dtype)


# ----------------------------------------------------------------------------
# model forward
# ----------------------------------------------------------------------------
def gru_model_forward(name_embeds, event_seq, params, *,
                      time_block=64, unroll=8, batch_block=128,
                      fc_col_tile=1024):
    """name_embeds: (B, T, name_dim) f32, event_seq: (B, T) int32 -> (B, n_items)."""
    f32, bf16 = jnp.float32, jnp.bfloat16

    # --- plain-JAX glue: embedding lookup (padding_idx row is zero) + concat ---
    event_embeds = jnp.take(params["event_emb"], event_seq, axis=0)      # (B,T,Ee)
    x = jnp.concatenate([name_embeds, event_embeds], axis=2).astype(f32)  # (B,T,D)

    B, T, D = x.shape
    H = params["w_hh_T"].shape[0]
    N = params["w_fc_T"].shape[1]

    # hardware-native padded sizes (bf16 MXU operands -> 16 sublanes / vreg)
    Bp = _round_up(B, 16)
    bt = Bp if Bp <= batch_block else batch_block
    Bp = _round_up(Bp, bt)
    Hp = _round_up(H, 128)
    Np = _round_up(N, 128)
    ct = min(fc_col_tile, Np)
    Np = _round_up(Np, ct)
    Tc = max(1, min(time_block, T))
    n_tblk = pl.cdiv(T, Tc)
    Tp = n_tblk * Tc
    unroll = max(1, min(unroll, Tc))

    # --- parameters: pad (zero padding keeps padded lanes inert), fold biases,
    #     cast MXU operands to bf16 (f32 accumulation happens in-kernel) ---
    w_ih = _pad_gate_cols(params["w_ih_T"], H, Hp).astype(bf16)          # (D, 3Hp)
    whh = _pad_gate_cols(
        jnp.pad(params["w_hh_T"], ((0, Hp - H), (0, 0))), H, Hp).astype(bf16)
    # b_ih plus the r/z slabs of b_hh fold into the fused gi bias; b_hn stays
    # separate (PyTorch GRU: n = tanh(W_in x + b_in + r*(W_hn h + b_hn))).
    b_gi = params["b_ih"] + jnp.concatenate(
        [params["b_hh"][:2 * H], jnp.zeros((H,), f32)])
    b_gi = _pad_gate_cols(b_gi[None, :], H, Hp).astype(f32)              # (1, 3Hp)
    b_hn = jnp.pad(params["b_hh"][2 * H:], (0, Hp - H)).astype(f32)[None, :]
    w_fc = jnp.pad(params["w_fc_T"], ((0, Hp - H), (0, Np - N))).astype(bf16)
    b_fc = jnp.pad(params["b_fc"], (0, Np - N)).astype(f32)

    # --- activations: time-major, padded batch/time, bf16 MXU operand ---
    x_tm = jnp.transpose(x, (1, 0, 2))                                   # (T, B, D)
    x_tm = jnp.pad(x_tm, ((0, Tp - T), (0, Bp - B), (0, 0))).astype(bf16)

    rec_est = (2 * (Tc * bt * D * 2)                         # x block (2 bufs)
               + 2 * (D * 3 * Hp * 2 + 3 * Hp * 4 + Hp * 3 * Hp * 2 + Hp * 4)
               + 2 * (bt * Hp * 2)                           # hT output
               + Tc * bt * 3 * Hp * 4 + bt * Hp * 4          # VMEM scratch
               + (4 << 20))

    # (1)+(2) fused input->gates matmul + GRU recurrence
    hT = pl.pallas_call(
        functools.partial(gru_recurrence_kernel, T, Hp, unroll),
        out_shape=jax.ShapeDtypeStruct((Bp, Hp), bf16),
        grid_spec=pltpu.PrefetchScalarGridSpec(
            num_scalar_prefetch=0,
            grid=(Bp // bt, n_tblk),            # (parallel batch, serial time)
            in_specs=[
                pl.BlockSpec((Tc, bt, D), lambda b, t: (t, b, 0)),
                pl.BlockSpec((D, 3 * Hp), lambda b, t: (0, 0)),
                pl.BlockSpec((1, 3 * Hp), lambda b, t: (0, 0)),
                pl.BlockSpec((Hp, 3 * Hp), lambda b, t: (0, 0)),
                pl.BlockSpec((1, Hp), lambda b, t: (0, 0)),
            ],
            out_specs=pl.BlockSpec((bt, Hp), lambda b, t: (b, 0)),
            scratch_shapes=[
                pltpu.VMEM((Tc * bt, 3 * Hp), jnp.float32),   # fused gi block
                pltpu.VMEM((bt, Hp), jnp.float32),            # carried h
            ],
        ),
        compiler_params=pltpu.CompilerParams(
            dimension_semantics=("parallel", "arbitrary"),
            vmem_limit_bytes=_vmem_limit(rec_est),
        ),
    )(x_tm, w_ih, b_gi, whh, b_hn)

    # (3) final FC (dropout is identity at inference), lane-dense and N-tiled
    logits_p = pallas_dense(hT, w_fc, b_fc, col_tile=ct)                 # (Bp, Np)
    return logits_p[:B, :N]


# ----------------------------------------------------------------------------
# pure-JAX f32 reference matching torch.nn.GRU / nn.Linear semantics
# ----------------------------------------------------------------------------
def gru_reference(name_embeds, event_seq, params):
    event_embeds = jnp.take(params["event_emb"], event_seq, axis=0)
    x = jnp.concatenate([name_embeds, event_embeds], axis=2)   # (B, T, D)
    B, T, _ = x.shape
    H = params["w_hh_T"].shape[0]
    h = jnp.zeros((B, H), jnp.float32)
    for t in range(T):
        x_t = x[:, t, :]
        gi = x_t @ params["w_ih_T"] + params["b_ih"]
        gh = h @ params["w_hh_T"] + params["b_hh"]
        i_r, i_z, i_n = gi[:, :H], gi[:, H:2 * H], gi[:, 2 * H:]
        h_r, h_z, h_n = gh[:, :H], gh[:, H:2 * H], gh[:, 2 * H:]
        r = jax.nn.sigmoid(i_r + h_r)
        z = jax.nn.sigmoid(i_z + h_z)
        n = jnp.tanh(i_n + r * h_n)
        h = (1.0 - z) * n + z * h
    return h @ params["w_fc_T"] + params["b_fc"]


def make_params(key, n_events, event_dim, name_dim, hidden, n_items):
    D = name_dim + event_dim
    ks = jax.random.split(key, 7)
    s = 0.1
    event_emb = s * jax.random.normal(ks[0], (n_events, event_dim), jnp.float32)
    event_emb = event_emb.at[0].set(0.0)                      # padding_idx=0
    return {
        "event_emb": event_emb,
        # stored pre-transposed: (in, out) so kernels do x @ W
        "w_ih_T": s * jax.random.normal(ks[1], (D, 3 * hidden), jnp.float32),
        "w_hh_T": s * jax.random.normal(ks[2], (hidden, 3 * hidden), jnp.float32),
        "b_ih": s * jax.random.normal(ks[3], (3 * hidden,), jnp.float32),
        "b_hh": s * jax.random.normal(ks[4], (3 * hidden,), jnp.float32),
        "w_fc_T": s * jax.random.normal(ks[5], (hidden, n_items), jnp.float32),
        "b_fc": s * jax.random.normal(ks[6], (n_items,), jnp.float32),
    }


if __name__ == "__main__":
    B, T = 2, 8
    name_dim, event_dim = 16, 16
    hidden = 32
    n_events, n_items = 10, 64

    key = jax.random.PRNGKey(0)
    k_p, k_x, k_e = jax.random.split(key, 3)
    params = make_params(k_p, n_events, event_dim, name_dim, hidden, n_items)

    name_embeds = jax.random.normal(k_x, (B, T, name_dim), jnp.float32)
    event_seq = jax.random.randint(k_e, (B, T), 0, n_events, jnp.int32)

    logits = gru_model_forward(name_embeds, event_seq, params)
    logits = jax.block_until_ready(logits)

    ref = gru_reference(name_embeds, event_seq, params)
    assert logits.shape == (B, n_items)
    # bf16 MXU operands (f32 accumulation) -> loosened tolerance vs f32 reference
    np.testing.assert_allclose(np.asarray(logits), np.asarray(ref),
                               rtol=3e-2, atol=3e-2)
    print("KERNEL_OK")
</pallas_src>

<mosaic_0001>
module attributes {stable_mosaic.version = 11 : i64} {
  func.func @gru_recurrence_kernel(%arg0: i32, %arg1: i32, %arg2: memref<8x16x32xbf16, #tpu.memory_space<vmem>>, %arg3: memref<32x384xbf16, #tpu.memory_space<vmem>>, %arg4: memref<1x384xf32, #tpu.memory_space<vmem>>, %arg5: memref<128x384xbf16, #tpu.memory_space<vmem>>, %arg6: memref<1x128xf32, #tpu.memory_space<vmem>>, %arg7: memref<16x128xbf16, #tpu.memory_space<vmem>>, %arg8: memref<128x384xf32, #tpu.memory_space<vmem>>, %arg9: memref<16x128xf32, #tpu.memory_space<vmem>>) attributes {dimension_semantics = [#tpu.dimension_semantics<parallel>, #tpu.dimension_semantics<arbitrary>], iteration_bounds = array<i64: 1, 1>, scalar_prefetch = 0 : i64, scratch_operands = 2 : i64, tpu.core_type = #tpu.core_type<tc>, window_params = [{transform_indices = @transform_0, window_bounds = array<i64: 8, 16, 32>}, {pipeline_mode = #tpu.pipeline_mode<synchronous>, transform_indices = @transform_1, window_bounds = array<i64: 32, 384>}, {pipeline_mode = #tpu.pipeline_mode<synchronous>, transform_indices = @transform_2, window_bounds = array<i64: 1, 384>}, {pipeline_mode = #tpu.pipeline_mode<synchronous>, transform_indices = @transform_3, window_bounds = array<i64: 128, 384>}, {pipeline_mode = #tpu.pipeline_mode<synchronous>, transform_indices = @transform_4, window_bounds = array<i64: 1, 128>}, {transform_indices = @transform_5, window_bounds = array<i64: 16, 128>}]} {
    %c0_i32 = arith.constant 0 : i32
    %0 = arith.cmpi eq, %arg1, %c0_i32 : i32
    %1 = arith.extui %0 : i1 to i32
    %c0_i32_0 = arith.constant 0 : i32
    %2 = arith.cmpi ne, %1, %c0_i32_0 : i32
    scf.if %2 {
      %cst_67 = arith.constant 0.000000e+00 : f32
      %284 = vector.broadcast %cst_67 : f32 to vector<16x128xf32>
      %c0_68 = arith.constant 0 : index
      %c0_69 = arith.constant 0 : index
      %285 = vector.load %arg9[%c0_68, %c0_69] : memref<16x128xf32, #tpu.memory_space<vmem>>, vector<16x128xf32>
      tpu.vector_store %arg9[%c0_68, %c0_69], %284 {strides = array<i32>} : memref<16x128xf32, #tpu.memory_space<vmem>>, vector<16x128xf32>,
    } else {
    }
    %c0 = arith.constant 0 : index
    %c0_1 = arith.constant 0 : index
    %c0_2 = arith.constant 0 : index
    %3 = vector.load %arg2[%c0, %c0_1, %c0_2] : memref<8x16x32xbf16, #tpu.memory_space<vmem>>, vector<8x16x32xbf16>
    %4 = vector.shape_cast %3 : vector<8x16x32xbf16> to vector<128x32xbf16>
    %c0_3 = arith.constant 0 : index
    %c0_4 = arith.constant 0 : index
    %5 = vector.load %arg3[%c0_3, %c0_4] : memref<32x384xbf16, #tpu.memory_space<vmem>>, vector<32x384xbf16>
    %cst = arith.constant dense<0.000000e+00> : vector<128x384xf32>
    %6 = tpu.matmul %4, %5, %cst {dimension_numbers = #tpu.dot_dimension_numbers<[1], [0], [0], [1], [0, 0, 1, 1], [], []>} : vector<128x32xbf16>, vector<32x384xbf16>, vector<128x384xf32> -> vector<128x384xf32>
    %c0_5 = arith.constant 0 : index
    %c0_6 = arith.constant 0 : index
    %7 = vector.load %arg4[%c0_5, %c0_6] : memref<1x384xf32, #tpu.memory_space<vmem>>, vector<1x384xf32>
    %8 = vector.broadcast %7 : vector<1x384xf32> to vector<128x384xf32>
    %9 = arith.addf %6, %8 : vector<128x384xf32>
    %c0_7 = arith.constant 0 : index
    %c0_8 = arith.constant 0 : index
    %10 = vector.load %arg8[%c0_7, %c0_8] : memref<128x384xf32, #tpu.memory_space<vmem>>, vector<128x384xf32>
    tpu.vector_store %arg8[%c0_7, %c0_8], %9 {strides = array<i32>} : memref<128x384xf32, #tpu.memory_space<vmem>>, vector<128x384xf32>,
    %c0_9 = arith.constant 0 : index
    %c0_10 = arith.constant 0 : index
    %11 = vector.load %arg5[%c0_9, %c0_10] : memref<128x384xbf16, #tpu.memory_space<vmem>>, vector<128x384xbf16>
    %c0_11 = arith.constant 0 : index
    %c0_12 = arith.constant 0 : index
    %12 = vector.load %arg6[%c0_11, %c0_12] : memref<1x128xf32, #tpu.memory_space<vmem>>, vector<1x128xf32>
    %13 = vector.shape_cast %12 : vector<1x128xf32> to vector<1x128xf32>
    %14 = vector.broadcast %13 : vector<1x128xf32> to vector<16x128xf32>
    %c0_13 = arith.constant 0 : index
    %c0_14 = arith.constant 0 : index
    %15 = vector.load %arg9[%c0_13, %c0_14] : memref<16x128xf32, #tpu.memory_space<vmem>>, vector<16x128xf32>
    %c0_i32_15 = arith.constant 0 : i32
    %c16_i32 = arith.constant 16 : i32
    %16 = arith.muli %c0_i32_15, %c16_i32 : i32
    %17 = tpu.assume_multiple %16, 16 : i32
    %18 = arith.index_cast %17 : i32 to index
    %c0_16 = arith.constant 0 : index
    %19 = vector.load %arg8[%18, %c0_16] : memref<128x384xf32, #tpu.memory_space<vmem>>, vector<16x384xf32>
    %20 = arith.truncf %15 : vector<16x128xf32> to vector<16x128xbf16>
    %cst_17 = arith.constant dense<0.000000e+00> : vector<16x384xf32>
    %21 = tpu.matmul %20, %11, %cst_17 {dimension_numbers = #tpu.dot_dimension_numbers<[1], [0], [0], [1], [0, 0, 1, 1], [], []>} : vector<16x128xbf16>, vector<128x384xbf16>, vector<16x384xf32> -> vector<16x384xf32>
    %22 = vector.extract_strided_slice %19 {offsets = [0, 0], sizes = [16, 128], strides = [1, 1]} : vector<16x384xf32> to vector<16x128xf32>
    %23 = vector.extract_strided_slice %21 {offsets = [0, 0], sizes = [16, 128], strides = [1, 1]} : vector<16x384xf32> to vector<16x128xf32>
    %24 = arith.addf %22, %23 : vector<16x128xf32>
    %25 = arith.negf %24 : vector<16x128xf32>
    %26 = math.exp %25 : vector<16x128xf32>
    %cst_18 = arith.constant 1.000000e+00 : f32
    %27 = vector.broadcast %cst_18 : f32 to vector<16x128xf32>
    %28 = arith.addf %27, %26 : vector<16x128xf32>
    %29 = arith.divf %27, %28 : vector<16x128xf32>
    %30 = vector.extract_strided_slice %19 {offsets = [0, 128], sizes = [16, 128], strides = [1, 1]} : vector<16x384xf32> to vector<16x128xf32>
    %31 = vector.extract_strided_slice %21 {offsets = [0, 128], sizes = [16, 128], strides = [1, 1]} : vector<16x384xf32> to vector<16x128xf32>
    %32 = arith.addf %30, %31 : vector<16x128xf32>
    %33 = arith.negf %32 : vector<16x128xf32>
    %34 = math.exp %33 : vector<16x128xf32>
    %cst_19 = arith.constant 1.000000e+00 : f32
    %35 = vector.broadcast %cst_19 : f32 to vector<16x128xf32>
    %36 = arith.addf %35, %34 : vector<16x128xf32>
    %37 = arith.divf %35, %36 : vector<16x128xf32>
    %38 = vector.extract_strided_slice %19 {offsets = [0, 256], sizes = [16, 128], strides = [1, 1]} : vector<16x384xf32> to vector<16x128xf32>
    %39 = vector.extract_strided_slice %21 {offsets = [0, 256], sizes = [16, 128], strides = [1, 1]} : vector<16x384xf32> to vector<16x128xf32>
    %40 = arith.addf %39, %14 : vector<16x128xf32>
    %41 = arith.mulf %29, %40 : vector<16x128xf32>
    %42 = arith.addf %38, %41 : vector<16x128xf32>
    %43 = math.tanh %42 : vector<16x128xf32>
    %cst_20 = arith.constant 1.000000e+00 : f32
    %44 = vector.broadcast %cst_20 : f32 to vector<16x128xf32>
    %45 = arith.subf %44, %37 : vector<16x128xf32>
    %46 = arith.mulf %45, %43 : vector<16x128xf32>
    %47 = arith.mulf %37, %15 : vector<16x128xf32>
    %48 = arith.addf %46, %47 : vector<16x128xf32>
    %c1_i32 = arith.constant 1 : i32
    %c16_i32_21 = arith.constant 16 : i32
    %49 = arith.muli %c1_i32, %c16_i32_21 : i32
    %50 = tpu.assume_multiple %49, 16 : i32
    %51 = arith.index_cast %50 : i32 to index
    %c0_22 = arith.constant 0 : index
    %52 = vector.load %arg8[%51, %c0_22] : memref<128x384xf32, #tpu.memory_space<vmem>>, vector<16x384xf32>
    %53 = arith.truncf %48 : vector<16x128xf32> to vector<16x128xbf16>
    %cst_23 = arith.constant dense<0.000000e+00> : vector<16x384xf32>
    %54 = tpu.matmul %53, %11, %cst_23 {dimension_numbers = #tpu.dot_dimension_numbers<[1], [0], [0], [1], [0, 0, 1, 1], [], []>} : vector<16x128xbf16>, vector<128x384xbf16>, vector<16x384xf32> -> vector<16x384xf32>
    %55 = vector.extract_strided_slice %52 {offsets = [0, 0], sizes = [16, 128], strides = [1, 1]} : vector<16x384xf32> to vector<16x128xf32>
    %56 = vector.extract_strided_slice %54 {offsets = [0, 0], sizes = [16, 128], strides = [1, 1]} : vector<16x384xf32> to vector<16x128xf32>
    %57 = arith.addf %55, %56 : vector<16x128xf32>
    %58 = arith.negf %57 : vector<16x128xf32>
    %59 = math.exp %58 : vector<16x128xf32>
    %cst_24 = arith.constant 1.000000e+00 : f32
    %60 = vector.broadcast %cst_24 : f32 to vector<16x128xf32>
    %61 = arith.addf %60, %59 : vector<16x128xf32>
    %62 = arith.divf %60, %61 : vector<16x128xf32>
    %63 = vector.extract_strided_slice %52 {offsets = [0, 128], sizes = [16, 128], strides = [1, 1]} : vector<16x384xf32> to vector<16x128xf32>
    %64 = vector.extract_strided_slice %54 {offsets = [0, 128], sizes = [16, 128], strides = [1, 1]} : vector<16x384xf32> to vector<16x128xf32>
    %65 = arith.addf %63, %64 : vector<16x128xf32>
    %66 = arith.negf %65 : vector<16x128xf32>
    %67 = math.exp %66 : vector<16x128xf32>
    %cst_25 = arith.constant 1.000000e+00 : f32
    %68 = vector.broadcast %cst_25 : f32 to vector<16x128xf32>
    %69 = arith.addf %68, %67 : vector<16x128xf32>
    %70 = arith.divf %68, %69 : vector<16x128xf32>
    %71 = vector.extract_strided_slice %52 {offsets = [0, 256], sizes = [16, 128], strides = [1, 1]} : vector<16x384xf32> to vector<16x128xf32>
    %72 = vector.extract_strided_slice %54 {offsets = [0, 256], sizes = [16, 128], strides = [1, 1]} : vector<16x384xf32> to vector<16x128xf32>
    %73 = arith.addf %72, %14 : vector<16x128xf32>
    %74 = arith.mulf %62, %73 : vector<16x128xf32>
    %75 = arith.addf %71, %74 : vector<16x128xf32>
    %76 = math.tanh %75 : vector<16x128xf32>
    %cst_26 = arith.constant 1.000000e+00 : f32
    %77 = vector.broadcast %cst_26 : f32 to vector<16x128xf32>
    %78 = arith.subf %77, %70 : vector<16x128xf32>
    %79 = arith.mulf %78, %76 : vector<16x128xf32>
    %80 = arith.mulf %70, %48 : vector<16x128xf32>
    %81 = arith.addf %79, %80 : vector<16x128xf32>
    %c2_i32 = arith.constant 2 : i32
    %c16_i32_27 = arith.constant 16 : i32
    %82 = arith.muli %c2_i32, %c16_i32_27 : i32
    %83 = tpu.assume_multiple %82, 16 : i32
    %84 = arith.index_cast %83 : i32 to index
    %c0_28 = arith.constant 0 : index
    %85 = vector.load %arg8[%84, %c0_28] : memref<128x384xf32, #tpu.memory_space<vmem>>, vector<16x384xf32>
    %86 = arith.truncf %81 : vector<16x128xf32> to vector<16x128xbf16>
    %cst_29 = arith.constant dense<0.000000e+00> : vector<16x384xf32>
    %87 = tpu.matmul %86, %11, %cst_29 {dimension_numbers = #tpu.dot_dimension_numbers<[1], [0], [0], [1], [0, 0, 1, 1], [], []>} : vector<16x128xbf16>, vector<128x384xbf16>, vector<16x384xf32> -> vector<16x384xf32>
    %88 = vector.extract_strided_slice %85 {offsets = [0, 0], sizes = [16, 128], strides = [1, 1]} : vector<16x384xf32> to vector<16x128xf32>
    %89 = vector.extract_strided_slice %87 {offsets = [0, 0], sizes = [16, 128], strides = [1, 1]} : vector<16x384xf32> to vector<16x128xf32>
    %90 = arith.addf %88, %89 : vector<16x128xf32>
    %91 = arith.negf %90 : vector<16x128xf32>
    %92 = math.exp %91 : vector<16x128xf32>
    %cst_30 = arith.constant 1.000000e+00 : f32
    %93 = vector.broadcast %cst_30 : f32 to vector<16x128xf32>
    %94 = arith.addf %93, %92 : vector<16x128xf32>
    %95 = arith.divf %93, %94 : vector<16x128xf32>
    %96 = vector.extract_strided_slice %85 {offsets = [0, 128], sizes = [16, 128], strides = [1, 1]} : vector<16x384xf32> to vector<16x128xf32>
    %97 = vector.extract_strided_slice %87 {offsets = [0, 128], sizes = [16, 128], strides = [1, 1]} : vector<16x384xf32> to vector<16x128xf32>
    %98 = arith.addf %96, %97 : vector<16x128xf32>
    %99 = arith.negf %98 : vector<16x128xf32>
    %100 = math.exp %99 : vector<16x128xf32>
    %cst_31 = arith.constant 1.000000e+00 : f32
    %101 = vector.broadcast %cst_31 : f32 to vector<16x128xf32>
    %102 = arith.addf %101, %100 : vector<16x128xf32>
    %103 = arith.divf %101, %102 : vector<16x128xf32>
    %104 = vector.extract_strided_slice %85 {offsets = [0, 256], sizes = [16, 128], strides = [1, 1]} : vector<16x384xf32> to vector<16x128xf32>
    %105 = vector.extract_strided_slice %87 {offsets = [0, 256], sizes = [16, 128], strides = [1, 1]} : vector<16x384xf32> to vector<16x128xf32>
    %106 = arith.addf %105, %14 : vector<16x128xf32>
    %107 = arith.mulf %95, %106 : vector<16x128xf32>
    %108 = arith.addf %104, %107 : vector<16x128xf32>
    %109 = math.tanh %108 : vector<16x128xf32>
    %cst_32 = arith.constant 1.000000e+00 : f32
    %110 = vector.broadcast %cst_32 : f32 to vector<16x128xf32>
    %111 = arith.subf %110, %103 : vector<16x128xf32>
    %112 = arith.mulf %111, %109 : vector<16x128xf32>
    %113 = arith.mulf %103, %81 : vector<16x128xf32>
    %114 = arith.addf %112, %113 : vector<16x128xf32>
    %c3_i32 = arith.constant 3 : i32
    %c16_i32_33 = arith.constant 16 : i32
    %115 = arith.muli %c3_i32, %c16_i32_33 : i32
    %116 = tpu.assume_multiple %115, 16 : i32
    %117 = arith.index_cast %116 : i32 to index
    %c0_34 = arith.constant 0 : index
    %118 = vector.load %arg8[%117, %c0_34] : memref<128x384xf32, #tpu.memory_space<vmem>>, vector<16x384xf32>
    %119 = arith.truncf %114 : vector<16x128xf32> to vector<16x128xbf16>
    %cst_35 = arith.constant dense<0.000000e+00> : vector<16x384xf32>
    %120 = tpu.matmul %119, %11, %cst_35 {dimension_numbers = #tpu.dot_dimension_numbers<[1], [0], [0], [1], [0, 0, 1, 1], [], []>} : vector<16x128xbf16>, vector<128x384xbf16>, vector<16x384xf32> -> vector<16x384xf32>
    %121 = vector.extract_strided_slice %118 {offsets = [0, 0], sizes = [16, 128], strides = [1, 1]} : vector<16x384xf32> to vector<16x128xf32>
    %122 = vector.extract_strided_slice %120 {offsets = [0, 0], sizes = [16, 128], strides = [1, 1]} : vector<16x384xf32> to vector<16x128xf32>
    %123 = arith.addf %121, %122 : vector<16x128xf32>
    %124 = arith.negf %123 : vector<16x128xf32>
    %125 = math.exp %124 : vector<16x128xf32>
    %cst_36 = arith.constant 1.000000e+00 : f32
    %126 = vector.broadcast %cst_36 : f32 to vector<16x128xf32>
    %127 = arith.addf %126, %125 : vector<16x128xf32>
    %128 = arith.divf %126, %127 : vector<16x128xf32>
    %129 = vector.extract_strided_slice %118 {offsets = [0, 128], sizes = [16, 128], strides = [1, 1]} : vector<16x384xf32> to vector<16x128xf32>
    %130 = vector.extract_strided_slice %120 {offsets = [0, 128], sizes = [16, 128], strides = [1, 1]} : vector<16x384xf32> to vector<16x128xf32>
    %131 = arith.addf %129, %130 : vector<16x128xf32>
    %132 = arith.negf %131 : vector<16x128xf32>
    %133 = math.exp %132 : vector<16x128xf32>
    %cst_37 = arith.constant 1.000000e+00 : f32
    %134 = vector.broadcast %cst_37 : f32 to vector<16x128xf32>
    %135 = arith.addf %134, %133 : vector<16x128xf32>
    %136 = arith.divf %134, %135 : vector<16x128xf32>
    %137 = vector.extract_strided_slice %118 {offsets = [0, 256], sizes = [16, 128], strides = [1, 1]} : vector<16x384xf32> to vector<16x128xf32>
    %138 = vector.extract_strided_slice %120 {offsets = [0, 256], sizes = [16, 128], strides = [1, 1]} : vector<16x384xf32> to vector<16x128xf32>
    %139 = arith.addf %138, %14 : vector<16x128xf32>
    %140 = arith.mulf %128, %139 : vector<16x128xf32>
    %141 = arith.addf %137, %140 : vector<16x128xf32>
    %142 = math.tanh %141 : vector<16x128xf32>
    %cst_38 = arith.constant 1.000000e+00 : f32
    %143 = vector.broadcast %cst_38 : f32 to vector<16x128xf32>
    %144 = arith.subf %143, %136 : vector<16x128xf32>
    %145 = arith.mulf %144, %142 : vector<16x128xf32>
    %146 = arith.mulf %136, %114 : vector<16x128xf32>
    %147 = arith.addf %145, %146 : vector<16x128xf32>
    %c4_i32 = arith.constant 4 : i32
    %c16_i32_39 = arith.constant 16 : i32
    %148 = arith.muli %c4_i32, %c16_i32_39 : i32
    %149 = tpu.assume_multiple %148, 16 : i32
    %150 = arith.index_cast %149 : i32 to index
    %c0_40 = arith.constant 0 : index
    %151 = vector.load %arg8[%150, %c0_40] : memref<128x384xf32, #tpu.memory_space<vmem>>, vector<16x384xf32>
    %152 = arith.truncf %147 : vector<16x128xf32> to vector<16x128xbf16>
    %cst_41 = arith.constant dense<0.000000e+00> : vector<16x384xf32>
    %153 = tpu.matmul %152, %11, %cst_41 {dimension_numbers = #tpu.dot_dimension_numbers<[1], [0], [0], [1], [0, 0, 1, 1], [], []>} : vector<16x128xbf16>, vector<128x384xbf16>, vector<16x384xf32> -> vector<16x384xf32>
    %154 = vector.extract_strided_slice %151 {offsets = [0, 0], sizes = [16, 128], strides = [1, 1]} : vector<16x384xf32> to vector<16x128xf32>
    %155 = vector.extract_strided_slice %153 {offsets = [0, 0], sizes = [16, 128], strides = [1, 1]} : vector<16x384xf32> to vector<16x128xf32>
    %156 = arith.addf %154, %155 : vector<16x128xf32>
    %157 = arith.negf %156 : vector<16x128xf32>
    %158 = math.exp %157 : vector<16x128xf32>
    %cst_42 = arith.constant 1.000000e+00 : f32
    %159 = vector.broadcast %cst_42 : f32 to vector<16x128xf32>
    %160 = arith.addf %159, %158 : vector<16x128xf32>
    %161 = arith.divf %159, %160 : vector<16x128xf32>
    %162 = vector.extract_strided_slice %151 {offsets = [0, 128], sizes = [16, 128], strides = [1, 1]} : vector<16x384xf32> to vector<16x128xf32>
    %163 = vector.extract_strided_slice %153 {offsets = [0, 128], sizes = [16, 128], strides = [1, 1]} : vector<16x384xf32> to vector<16x128xf32>
    %164 = arith.addf %162, %163 : vector<16x128xf32>
    %165 = arith.negf %164 : vector<16x128xf32>
    %166 = math.exp %165 : vector<16x128xf32>
    %cst_43 = arith.constant 1.000000e+00 : f32
    %167 = vector.broadcast %cst_43 : f32 to vector<16x128xf32>
    %168 = arith.addf %167, %166 : vector<16x128xf32>
    %169 = arith.divf %167, %168 : vector<16x128xf32>
    %170 = vector.extract_strided_slice %151 {offsets = [0, 256], sizes = [16, 128], strides = [1, 1]} : vector<16x384xf32> to vector<16x128xf32>
    %171 = vector.extract_strided_slice %153 {offsets = [0, 256], sizes = [16, 128], strides = [1, 1]} : vector<16x384xf32> to vector<16x128xf32>
    %172 = arith.addf %171, %14 : vector<16x128xf32>
    %173 = arith.mulf %161, %172 : vector<16x128xf32>
    %174 = arith.addf %170, %173 : vector<16x128xf32>
    %175 = math.tanh %174 : vector<16x128xf32>
    %cst_44 = arith.constant 1.000000e+00 : f32
    %176 = vector.broadcast %cst_44 : f32 to vector<16x128xf32>
    %177 = arith.subf %176, %169 : vector<16x128xf32>
    %178 = arith.mulf %177, %175 : vector<16x128xf32>
    %179 = arith.mulf %169, %147 : vector<16x128xf32>
    %180 = arith.addf %178, %179 : vector<16x128xf32>
    %c5_i32 = arith.constant 5 : i32
    %c16_i32_45 = arith.constant 16 : i32
    %181 = arith.muli %c5_i32, %c16_i32_45 : i32
    %182 = tpu.assume_multiple %181, 16 : i32
    %183 = arith.index_cast %182 : i32 to index
    %c0_46 = arith.constant 0 : index
    %184 = vector.load %arg8[%183, %c0_46] : memref<128x384xf32, #tpu.memory_space<vmem>>, vector<16x384xf32>
    %185 = arith.truncf %180 : vector<16x128xf32> to vector<16x128xbf16>
    %cst_47 = arith.constant dense<0.000000e+00> : vector<16x384xf32>
    %186 = tpu.matmul %185, %11, %cst_47 {dimension_numbers = #tpu.dot_dimension_numbers<[1], [0], [0], [1], [0, 0, 1, 1], [], []>} : vector<16x128xbf16>, vector<128x384xbf16>, vector<16x384xf32> -> vector<16x384xf32>
    %187 = vector.extract_strided_slice %184 {offsets = [0, 0], sizes = [16, 128], strides = [1, 1]} : vector<16x384xf32> to vector<16x128xf32>
    %188 = vector.extract_strided_slice %186 {offsets = [0, 0], sizes = [16, 128], strides = [1, 1]} : vector<16x384xf32> to vector<16x128xf32>
    %189 = arith.addf %187, %188 : vector<16x128xf32>
    %190 = arith.negf %189 : vector<16x128xf32>
    %191 = math.exp %190 : vector<16x128xf32>
    %cst_48 = arith.constant 1.000000e+00 : f32
    %192 = vector.broadcast %cst_48 : f32 to vector<16x128xf32>
    %193 = arith.addf %192, %191 : vector<16x128xf32>
    %194 = arith.divf %192, %193 : vector<16x128xf32>
    %195 = vector.extract_strided_slice %184 {offsets = [0, 128], sizes = [16, 128], strides = [1, 1]} : vector<16x384xf32> to vector<16x128xf32>
    %196 = vector.extract_strided_slice %186 {offsets = [0, 128], sizes = [16, 128], strides = [1, 1]} : vector<16x384xf32> to vector<16x128xf32>
    %197 = arith.addf %195, %196 : vector<16x128xf32>
    %198 = arith.negf %197 : vector<16x128xf32>
    %199 = math.exp %198 : vector<16x128xf32>
    %cst_49 = arith.constant 1.000000e+00 : f32
    %200 = vector.broadcast %cst_49 : f32 to vector<16x128xf32>
    %201 = arith.addf %200, %199 : vector<16x128xf32>
    %202 = arith.divf %200, %201 : vector<16x128xf32>
    %203 = vector.extract_strided_slice %184 {offsets = [0, 256], sizes = [16, 128], strides = [1, 1]} : vector<16x384xf32> to vector<16x128xf32>
    %204 = vector.extract_strided_slice %186 {offsets = [0, 256], sizes = [16, 128], strides = [1, 1]} : vector<16x384xf32> to vector<16x128xf32>
    %205 = arith.addf %204, %14 : vector<16x128xf32>
    %206 = arith.mulf %194, %205 : vector<16x128xf32>
    %207 = arith.addf %203, %206 : vector<16x128xf32>
    %208 = math.tanh %207 : vector<16x128xf32>
    %cst_50 = arith.constant 1.000000e+00 : f32
    %209 = vector.broadcast %cst_50 : f32 to vector<16x128xf32>
    %210 = arith.subf %209, %202 : vector<16x128xf32>
    %211 = arith.mulf %210, %208 : vector<16x128xf32>
    %212 = arith.mulf %202, %180 : vector<16x128xf32>
    %213 = arith.addf %211, %212 : vector<16x128xf32>
    %c6_i32 = arith.constant 6 : i32
    %c16_i32_51 = arith.constant 16 : i32
    %214 = arith.muli %c6_i32, %c16_i32_51 : i32
    %215 = tpu.assume_multiple %214, 16 : i32
    %216 = arith.index_cast %215 : i32 to index
    %c0_52 = arith.constant 0 : index
    %217 = vector.load %arg8[%216, %c0_52] : memref<128x384xf32, #tpu.memory_space<vmem>>, vector<16x384xf32>
    %218 = arith.truncf %213 : vector<16x128xf32> to vector<16x128xbf16>
    %cst_53 = arith.constant dense<0.000000e+00> : vector<16x384xf32>
    %219 = tpu.matmul %218, %11, %cst_53 {dimension_numbers = #tpu.dot_dimension_numbers<[1], [0], [0], [1], [0, 0, 1, 1], [], []>} : vector<16x128xbf16>, vector<128x384xbf16>, vector<16x384xf32> -> vector<16x384xf32>
    %220 = vector.extract_strided_slice %217 {offsets = [0, 0], sizes = [16, 128], strides = [1, 1]} : vector<16x384xf32> to vector<16x128xf32>
    %221 = vector.extract_strided_slice %219 {offsets = [0, 0], sizes = [16, 128], strides = [1, 1]} : vector<16x384xf32> to vector<16x128xf32>
    %222 = arith.addf %220, %221 : vector<16x128xf32>
    %223 = arith.negf %222 : vector<16x128xf32>
    %224 = math.exp %223 : vector<16x128xf32>
    %cst_54 = arith.constant 1.000000e+00 : f32
    %225 = vector.broadcast %cst_54 : f32 to vector<16x128xf32>
    %226 = arith.addf %225, %224 : vector<16x128xf32>
    %227 = arith.divf %225, %226 : vector<16x128xf32>
    %228 = vector.extract_strided_slice %217 {offsets = [0, 128], sizes = [16, 128], strides = [1, 1]} : vector<16x384xf32> to vector<16x128xf32>
    %229 = vector.extract_strided_slice %219 {offsets = [0, 128], sizes = [16, 128], strides = [1, 1]} : vector<16x384xf32> to vector<16x128xf32>
    %230 = arith.addf %228, %229 : vector<16x128xf32>
    %231 = arith.negf %230 : vector<16x128xf32>
    %232 = math.exp %231 : vector<16x128xf32>
    %cst_55 = arith.constant 1.000000e+00 : f32
    %233 = vector.broadcast %cst_55 : f32 to vector<16x128xf32>
    %234 = arith.addf %233, %232 : vector<16x128xf32>
    %235 = arith.divf %233, %234 : vector<16x128xf32>
    %236 = vector.extract_strided_slice %217 {offsets = [0, 256], sizes = [16, 128], strides = [1, 1]} : vector<16x384xf32> to vector<16x128xf32>
    %237 = vector.extract_strided_slice %219 {offsets = [0, 256], sizes = [16, 128], strides = [1, 1]} : vector<16x384xf32> to vector<16x128xf32>
    %238 = arith.addf %237, %14 : vector<16x128xf32>
    %239 = arith.mulf %227, %238 : vector<16x128xf32>
    %240 = arith.addf %236, %239 : vector<16x128xf32>
    %241 = math.tanh %240 : vector<16x128xf32>
    %cst_56 = arith.constant 1.000000e+00 : f32
    %242 = vector.broadcast %cst_56 : f32 to vector<16x128xf32>
    %243 = arith.subf %242, %235 : vector<16x128xf32>
    %244 = arith.mulf %243, %241 : vector<16x128xf32>
    %245 = arith.mulf %235, %213 : vector<16x128xf32>
    %246 = arith.addf %244, %245 : vector<16x128xf32>
    %c7_i32 = arith.constant 7 : i32
    %c16_i32_57 = arith.constant 16 : i32
    %247 = arith.muli %c7_i32, %c16_i32_57 : i32
    %248 = tpu.assume_multiple %247, 16 : i32
    %249 = arith.index_cast %248 : i32 to index
    %c0_58 = arith.constant 0 : index
    %250 = vector.load %arg8[%249, %c0_58] : memref<128x384xf32, #tpu.memory_space<vmem>>, vector<16x384xf32>
    %251 = arith.truncf %246 : vector<16x128xf32> to vector<16x128xbf16>
    %cst_59 = arith.constant dense<0.000000e+00> : vector<16x384xf32>
    %252 = tpu.matmul %251, %11, %cst_59 {dimension_numbers = #tpu.dot_dimension_numbers<[1], [0], [0], [1], [0, 0, 1, 1], [], []>} : vector<16x128xbf16>, vector<128x384xbf16>, vector<16x384xf32> -> vector<16x384xf32>
    %253 = vector.extract_strided_slice %250 {offsets = [0, 0], sizes = [16, 128], strides = [1, 1]} : vector<16x384xf32> to vector<16x128xf32>
    %254 = vector.extract_strided_slice %252 {offsets = [0, 0], sizes = [16, 128], strides = [1, 1]} : vector<16x384xf32> to vector<16x128xf32>
    %255 = arith.addf %253, %254 : vector<16x128xf32>
    %256 = arith.negf %255 : vector<16x128xf32>
    %257 = math.exp %256 : vector<16x128xf32>
    %cst_60 = arith.constant 1.000000e+00 : f32
    %258 = vector.broadcast %cst_60 : f32 to vector<16x128xf32>
    %259 = arith.addf %258, %257 : vector<16x128xf32>
    %260 = arith.divf %258, %259 : vector<16x128xf32>
    %261 = vector.extract_strided_slice %250 {offsets = [0, 128], sizes = [16, 128], strides = [1, 1]} : vector<16x384xf32> to vector<16x128xf32>
    %262 = vector.extract_strided_slice %252 {offsets = [0, 128], sizes = [16, 128], strides = [1, 1]} : vector<16x384xf32> to vector<16x128xf32>
    %263 = arith.addf %261, %262 : vector<16x128xf32>
    %264 = arith.negf %263 : vector<16x128xf32>
    %265 = math.exp %264 : vector<16x128xf32>
    %cst_61 = arith.constant 1.000000e+00 : f32
    %266 = vector.broadcast %cst_61 : f32 to vector<16x128xf32>
    %267 = arith.addf %266, %265 : vector<16x128xf32>
    %268 = arith.divf %266, %267 : vector<16x128xf32>
    %269 = vector.extract_strided_slice %250 {offsets = [0, 256], sizes = [16, 128], strides = [1, 1]} : vector<16x384xf32> to vector<16x128xf32>
    %270 = vector.extract_strided_slice %252 {offsets = [0, 256], sizes = [16, 128], strides = [1, 1]} : vector<16x384xf32> to vector<16x128xf32>
    %271 = arith.addf %270, %14 : vector<16x128xf32>
    %272 = arith.mulf %260, %271 : vector<16x128xf32>
    %273 = arith.addf %269, %272 : vector<16x128xf32>
    %274 = math.tanh %273 : vector<16x128xf32>
    %cst_62 = arith.constant 1.000000e+00 : f32
    %275 = vector.broadcast %cst_62 : f32 to vector<16x128xf32>
    %276 = arith.subf %275, %268 : vector<16x128xf32>
    %277 = arith.mulf %276, %274 : vector<16x128xf32>
    %278 = arith.mulf %268, %246 : vector<16x128xf32>
    %279 = arith.addf %277, %278 : vector<16x128xf32>
    %c8_i32 = arith.constant 8 : i32
    %c0_63 = arith.constant 0 : index
    %c0_64 = arith.constant 0 : index
    %280 = vector.load %arg9[%c0_63, %c0_64] : memref<16x128xf32, #tpu.memory_space<vmem>>, vector<16x128xf32>
    tpu.vector_store %arg9[%c0_63, %c0_64], %279 {strides = array<i32>} : memref<16x128xf32, #tpu.memory_space<vmem>>, vector<16x128xf32>,
    %c0_i32_65 = arith.constant 0 : i32
    %281 = arith.cmpi eq, %arg1, %c0_i32_65 : i32
    %282 = arith.extui %281 : i1 to i32
    %c0_i32_66 = arith.constant 0 : i32
    %283 = arith.cmpi ne, %282, %c0_i32_66 : i32
    scf.if %283 {
      %c0_67 = arith.constant 0 : index
      %c0_68 = arith.constant 0 : index
      %284 = vector.load %arg9[%c0_67, %c0_68] : memref<16x128xf32, #tpu.memory_space<vmem>>, vector<16x128xf32>
      %285 = arith.truncf %284 : vector<16x128xf32> to vector<16x128xbf16>
      %c0_69 = arith.constant 0 : index
      %c0_70 = arith.constant 0 : index
      %286 = vector.load %arg7[%c0_69, %c0_70] : memref<16x128xbf16, #tpu.memory_space<vmem>>, vector<16x128xbf16>
      tpu.vector_store %arg7[%c0_69, %c0_70], %285 {strides = array<i32>} : memref<16x128xbf16, #tpu.memory_space<vmem>>, vector<16x128xbf16>,
    } else {
    }
    return
  }
  func.func @transform_0(%arg0: i32, %arg1: i32) -> (i32, i32, i32) {
    %c0_i32 = arith.constant 0 : i32
    %c0_i32_0 = arith.constant 0 : i32
    return %arg1, %arg0, %c0_i32 : i32, i32, i32
  }
  func.func @transform_1(%arg0: i32, %arg1: i32) -> (i32, i32) {
    %c0_i32 = arith.constant 0 : i32
    %c0_i32_0 = arith.constant 0 : i32
    %c0_i32_1 = arith.constant 0 : i32
    return %c0_i32, %c0_i32_0 : i32, i32
  }
  func.func @transform_2(%arg0: i32, %arg1: i32) -> (i32, i32) {
    %c0_i32 = arith.constant 0 : i32
    %c0_i32_0 = arith.constant 0 : i32
    %c0_i32_1 = arith.constant 0 : i32
    return %c0_i32, %c0_i32_0 : i32, i32
  }
  func.func @transform_3(%arg0: i32, %arg1: i32) -> (i32, i32) {
    %c0_i32 = arith.constant 0 : i32
    %c0_i32_0 = arith.constant 0 : i32
    %c0_i32_1 = arith.constant 0 : i32
    return %c0_i32, %c0_i32_0 : i32, i32
  }
  func.func @transform_4(%arg0: i32, %arg1: i32) -> (i32, i32) {
    %c0_i32 = arith.constant 0 : i32
    %c0_i32_0 = arith.constant 0 : i32
    %c0_i32_1 = arith.constant 0 : i32
    return %c0_i32, %c0_i32_0 : i32, i32
  }
  func.func @transform_5(%arg0: i32, %arg1: i32) -> (i32, i32) {
    %c0_i32 = arith.constant 0 : i32
    %c0_i32_0 = arith.constant 0 : i32
    return %arg0, %c0_i32 : i32, i32
  }
}

</mosaic_0001>

<bundles_post_ra>
// kernel: tpu_custom_call.1
= control target key start
LH: loop header
LB: loop body
LE: loop exit
PB: predicated region body
PF: predicated region fallthrough
CT: control target
= control target key end

     0   :  { %10 = vsyncpa [#allocation5], 0  ;;  %s3081_s0 = inlined_call_operand.hbm [shape: bf16[8,16,32], index: 0, kind: input, shape index: {}]   ;;  %s3082_s1 = inlined_call_operand.hbm [shape: bf16[32,384], index: 1, kind: input, shape index: {}]   ;;  %s3083_s2 = inlined_call_operand.hbm [shape: f32[1,384], index: 2, kind: input, shape index: {}]   ;;  %s3084_s3 = inlined_call_operand.hbm [shape: bf16[128,384], index: 3, kind: input, shape index: {}]   ;;  %s3085_s4 = inlined_call_operand.vmem [shape: f32[1,128], index: 4, kind: input, shape index: {}]   ;;  %s3086_s5 = inlined_call_operand.hbm [shape: bf16[16,128], index: 5, kind: output, shape index: {}]  }
   0x1   :  { %11 = vsyncpa [#allocation8], 0 }
   0x2   :  { %12 = vsyncpa [#allocation11], 0  ;;  %s31_s20 = sshll.u32 %s3082_s1, 4  ;;  %s32_s20 = int_to_ptr.hbm [resolvable:$true] %s31_s20 }
   0x3   :  { %13 = vsyncpa [#allocation6], 0  ;;  %s2353_s21 = smov [#allocation7]   ;;  %s18_s25 = sshll.u32 %s3081_s0, 4  ;;  %s19_s25 = int_to_ptr.hbm [resolvable:$true] %s18_s25 }
   0x4   :  { %s33_s22 = sshll.u32 %s2353_s21, 4  ;;  %s2354_s26 = smov 192   ;;  %s34_s22 = int_to_ptr.vmem [resolvable:$true] %s33_s22 }
   0x5   :  { %s2355_s27 = smov 12   ;;  %s2356_s28 = smov [#allocation4]  }
   0x6   :  { %39 = dma.hbm_to_vmem [thread:$0]  %s32_s20, 768, %s34_s22, [#allocation8], %s2354_s26, %s2354_s26, %s2355_s27  }
   0x7   :  { %s20_s29 = sshll.u32 %s2356_s28, 4  ;;  %s2357_s30 = smov 64   ;;  %s21_s29 = int_to_ptr.vmem [resolvable:$true] %s20_s29 }
   0x8   :  { %s2358_s6 = smov 4   ;;  %s45_s8 = sshll.u32 %s3083_s2, 4  ;;  %s46_s8 = int_to_ptr.hbm [resolvable:$true] %s45_s8 }
   0x9   :  { %26 = dma.hbm_to_vmem [thread:$0]  %s19_s25, 1024, %s21_s29, [#allocation5], %s2357_s30, %s2357_s30, %s2358_s6  }
   0xa   :  { %s2359_s9 = smov [#allocation9]   ;;  %s55_s12 = sshll.u32 %s3084_s3, 4  ;;  %s56_s12 = int_to_ptr.hbm [resolvable:$true] %s55_s12 }
   0xb   :  { %s47_s0 = sshll.u32 %s2359_s9, 4  ;;  %s2360_s13 = smov [#allocation10]   ;;  %s48_s0 = int_to_ptr.vmem [resolvable:$true] %s47_s0 }
   0xc   :  { %50 = dma.hbm_to_vmem [thread:$0]  %s46_s8, 48, %s48_s0, [#allocation8]  }
   0xd   :  { %s57_s14 = sshll.u32 %s2360_s13, 4  ;;  %s58_s14 = int_to_ptr.vmem [resolvable:$true] %s57_s14 }
   0xe   :  { %63 = dma.hbm_to_vmem [thread:$0]  %s56_s12, 3072, %s58_s14, [#allocation11], %s2354_s26, %s2354_s26, %s2355_s27  }
   0xf   :  { %2345 = dma.done.wait [#allocation5], 1024  }
  0x10   :  { %2346 = vsyncadd [#allocation5], 4294966272 }
  0x11   :  { %2347 = dma.done.wait [#allocation8], 816  }
  0x12   :  { %2348 = vsyncadd [#allocation8], 4294966480 }
  0x13   :  { %2349 = dma.done.wait [#allocation11], 3072  }
  0x14   :  { %2350 = vsyncadd [#allocation11], 4294964224  ;;  %v1968_v0 = vld [vmem:[#allocation10 + $0xa8] sm:$0xf]  ;;  %v2046_v1 = vld [vmem:[#allocation10 + $0xb0] sm:$0xf0] }
  0x15   :  { %v1956_v2 = vld [vmem:[#allocation10 + $0x90] sm:$0xf]  ;;  %v2408_v3 = vor.u32 %v2046_v1, %v1968_v0  ;;  %v2043_v4 = vld [vmem:[#allocation10 + $0x98] sm:$0xf0]  ;;  %v1944_v6 = vld [vmem:[#allocation10 + $0x78] sm:$0xf] }
  0x16   :  { %v2411_v5 = vor.u32 %v2043_v4, %v1956_v2  ;;  %v2040_v7 = vld [vmem:[#allocation10 + $0x80] sm:$0xf0]  ;;  %v2022_v9 = vld [vmem:[#allocation7 + $0x20] sm:$0xf0]  ;;  %v1836_v12 = vld [vmem:[#allocation7] sm:$0xf] }
  0x17   :  { %589 = vmatpush.bf16.msra.mxu3 %v2408_v3  ;;  %v1848_v8 = vld [vmem:[#allocation7 + $0x18] sm:$0xf]  ;;  %v2414_v10 = vor.u32 %v2040_v7, %v1944_v6  ;;  %v1932_v13 = vld [vmem:[#allocation10 + $0x60] sm:$0xf]  ;;  %v2037_v14 = vld [vmem:[#allocation10 + $0x68] sm:$0xf0] }
  0x18   :  { %v1849_v11 = vor.u32 %v2022_v9, %v1848_v8  ;;  %v2019_v15 = vld [vmem:[#allocation7 + $0x8] sm:$0xf0]  ;;  %v2045_v16 = vld [vmem:[#allocation10 + $0xac] sm:$0xf]  ;;  %v2417_v19 = vor.u32 %v2037_v14, %v1932_v13  ;;  %v1920_v20 = vld [vmem:[#allocation10 + $0x48] sm:$0xf] }
  0x19   :  { %v1970_v17 = vld [vmem:[#allocation10 + $0xb4] sm:$0xf0]  ;;  %v1837_v18 = vor.u32 %v2019_v15, %v1836_v12  ;;  %v2034_v21 = vld [vmem:[#allocation10 + $0x50] sm:$0xf0]  ;;  %v2421_v23 = vld [vmem:[#allocation4] sm:$0xff]  ;;  %vm193_vm0 = vcmask 261120  }
  0x1a   :  { %224 = vmatpush.bf16.msra.mxu0 %v1849_v11  ;;  %v2419_v22 = vor.u32 %v2045_v16, %v1970_v17  ;;  %v2042_v24 = vld [vmem:[#allocation10 + $0x94] sm:$0xf]  ;;  %v1958_v25 = vld [vmem:[#allocation10 + $0x9c] sm:$0xf0]  ;;  %v2425_v26 = vor.u32 %v2034_v21, %v1920_v20  ;;  %v1908_v27 = vld [vmem:[#allocation10 + $0x30] sm:$0xf] }
  0x1b   :  { %590 = vmatpush.bf16.msra.mxu3 %v2411_v5  ;;  %v2031_v28 = vld [vmem:[#allocation10 + $0x38] sm:$0xf0]  ;;  %v2427_v29 = vor.u32 %v2042_v24, %v1958_v25  ;;  %v1946_v31 = vld [vmem:[#allocation10 + $0x84] sm:$0xf0]  ;;  %v1896_v33 = vld [vmem:[#allocation10 + $0x18] sm:$0xf] }
  0x1c   :  { %v2039_v30 = vld [vmem:[#allocation10 + $0x7c] sm:$0xf]  ;;  %v2433_v32 = vor.u32 %v2031_v28, %v1908_v27  ;;  %v2028_v34 = vld [vmem:[#allocation10 + $0x20] sm:$0xf0]  ;;  %v1934_v37 = vld [vmem:[#allocation10 + $0x6c] sm:$0xf0] }
  0x1d   :  { %v2435_v35 = vor.u32 %v2039_v30, %v1946_v31  ;;  %v2036_v36 = vld [vmem:[#allocation10 + $0x64] sm:$0xf]  ;;  %v2439_v38 = vor.u32 %v2028_v34, %v1896_v33  ;;  %v1884_v39 = vld [vmem:[#allocation10] sm:$0xf]  ;;  %v2025_v40 = vld [vmem:[#allocation10 + $0x8] sm:$0xf0] }
  0x1e   :  { %225 = vmatpush.bf16.msra.mxu0 %v1837_v18  ;;  %v2441_v41 = vor.u32 %v2036_v36, %v1934_v37  ;;  %v2021_v42 = vld [vmem:[#allocation7 + $0x1c] sm:$0xf]  ;;  %v1850_v43 = vld [vmem:[#allocation7 + $0x24] sm:$0xf0]  ;;  %v2033_v44 = vld [vmem:[#allocation10 + $0x4c] sm:$0xf]  ;;  %v2445_v47 = vor.u32 %v2025_v40, %v1884_v39 }
  0x1f   :  { %591 = vmatpush.bf16.msra.mxu3 %v2414_v10  ;;  %v1922_v45 = vld [vmem:[#allocation10 + $0x54] sm:$0xf0]  ;;  %v1853_v46 = vor.u32 %v2021_v42, %v1850_v43  ;;  %v2030_v49 = vld [vmem:[#allocation10 + $0x34] sm:$0xf]  ;;  %v1976_v50 = vld [vmem:[#allocation10 + $0xb0] sm:$0xf] }
  0x20   :  { %v2447_v48 = vor.u32 %v2033_v44, %v1922_v45  ;;  %v2047_v51 = vld [vmem:[#allocation10 + $0xb8] sm:$0xf0]  ;;  %v1910_v52 = vld [vmem:[#allocation10 + $0x3c] sm:$0xf0]  ;;  %v2018_v53 = vld [vmem:[#allocation7 + $0x4] sm:$0xf] }
  0x21   :  { %1858 = vmatmul.msk.bf16.vlgmr.msra.gmra.mxu0 %vm193_vm0, %v2421_v23  ;;  %273 = vmatpush.bf16.msra.mxu1 %v1853_v46  ;;  %v1838_v54 = vld [vmem:[#allocation7 + $0xc] sm:$0xf0]  ;;  %v2451_v56 = vor.u32 %v2047_v51, %v1976_v50  ;;  %v2454_v57 = vor.u32 %v2030_v49, %v1910_v52  ;;  %v1964_v58 = vld [vmem:[#allocation10 + $0x98] sm:$0xf]  ;;  %v2044_v59 = vld [vmem:[#allocation10 + $0xa0] sm:$0xf0] }
  0x22   :  { %751 = vmatpush.bf16.msrb.mxu0 %v2419_v22  ;;  %v1841_v55 = vor.u32 %v2018_v53, %v1838_v54  ;;  %v2027_v60 = vld [vmem:[#allocation10 + $0x1c] sm:$0xf]  ;;  %v1898_v61 = vld [vmem:[#allocation10 + $0x24] sm:$0xf0]  ;;  %v2361_v62 = vmov 0.0|0.0   ;;  %v2459_v63 = vor.u32 %v2044_v59, %v1964_v58  ;;  %v2011_v39 = vld [vmem:[#allocation4 + $0x8] sm:$0xff] }
  0x23   :  { %592 = vmatpush.bf16.msra.mxu3 %v2417_v19  ;;  %v2464_v0 = vor.u32 %v2027_v60, %v1898_v61  ;;  %v1952_v1 = vld [vmem:[#allocation10 + $0x80] sm:$0xf]  ;;  %v2041_v2 = vld [vmem:[#allocation10 + $0x88] sm:$0xf0]  ;;  %v2024_v4 = vld [vmem:[#allocation10 + $0x4] sm:$0xf] }
  0x24   :  { %v1886_v6 = vld [vmem:[#allocation10 + $0xc] sm:$0xf0]  ;;  %v2468_v7 = vor.u32 %v2041_v2, %v1952_v1  ;;  %v1940_v9 = vld [vmem:[#allocation10 + $0x68] sm:$0xf]  ;;  %v2038_v11 = vld [vmem:[#allocation10 + $0x70] sm:$0xf0] }
  0x25   :  { %274 = vmatpush.bf16.msra.mxu1 %v1841_v55  ;;  %v2471_v8 = vor.u32 %v2024_v4, %v1886_v6  ;;  %v2475_v12 = vor.u32 %v2038_v11, %v1940_v9  ;;  %v1928_v13 = vld [vmem:[#allocation10 + $0x50] sm:$0xf]  ;;  %v2035_v14 = vld [vmem:[#allocation10 + $0x58] sm:$0xf0]  ;;  %v1856_v15 = vld [vmem:[#allocation7 + $0x20] sm:$0xf] }
  0x26   :  { %752 = vmatpush.bf16.msrb.mxu0 %v2427_v29  ;;  %v2023_v16 = vld [vmem:[#allocation7 + $0x28] sm:$0xf0]  ;;  %v2480_v18 = vor.u32 %v2035_v14, %v1928_v13  ;;  %v2032_v21 = vld [vmem:[#allocation10 + $0x40] sm:$0xf0]  ;;  %v1844_v24 = vld [vmem:[#allocation7 + $0x8] sm:$0xf] }
  0x27   :  { %593 = vmatpush.bf16.msra.mxu3 %v2425_v26  ;;  %v1857_v17 = vor.u32 %v2023_v16, %v1856_v15  ;;  %v1916_v20 = vld [vmem:[#allocation10 + $0x38] sm:$0xf]  ;;  %v2020_v25 = vld [vmem:[#allocation7 + $0x10] sm:$0xf0]  ;;  %v2029_v31 = vld [vmem:[#allocation10 + $0x28] sm:$0xf0] }
  0x28   :  { %1866 = vmatmul.msk.bf16.vlgmr.msra.gmra.mxu1 %vm193_vm0, %v2421_v23  ;;  %v1845_v27 = vor.u32 %v2020_v25, %v1844_v24  ;;  %v2485_v28 = vor.u32 %v2032_v21, %v1916_v20  ;;  %v1904_v30 = vld [vmem:[#allocation10 + $0x20] sm:$0xf]  ;;  %v1892_v34 = vld [vmem:[#allocation10 + $0x8] sm:$0xf]  ;;  %v2026_v36 = vld [vmem:[#allocation10 + $0x10] sm:$0xf0] }
  0x29   :  { %765 = vmatpush.bf16.msrb.mxu1 %v2451_v56  ;;  %322 = vmatpush.bf16.msra.mxu2 %v1857_v17  ;;  %v2493_v33 = vor.u32 %v2029_v31, %v1904_v30  ;;  %v2499_v37 = vor.u32 %v2026_v36, %v1892_v34  ;;  %v2013_v40 = vld [vmem:[#allocation4 + $0x18] sm:$0xff]  ;;  %v2014_v42 = vld [vmem:[#allocation4 + $0x20] sm:$0xff]  ;;  %v2567_v43 = vld [vmem:[#allocation9] sm:$0x7]  ;;  %s1780_s20 = sshll.u32 %s3086_s5, 4  ;;  %s1781_s20 = int_to_ptr.hbm [resolvable:$true] %s1780_s20 }
  0x2a   :  { %753 = vmatpush.bf16.msrb.mxu0 %v2435_v35  ;;  %v2570_v45 = vperm.slane %v2567_v43, 0  ;;  %v2015_v46 = vld [vmem:[#allocation4 + $0x28] sm:$0xff]  ;;  %v2016_v59 = vld [vmem:[#allocation4 + $0x30] sm:$0xff]  ;;  %v2578_v61 = vperm.slane %v2567_v43, 1  ;;  %v2017_v17 = vld [vmem:[#allocation4 + $0x38] sm:$0xff] }
  0x2b   :  { %594 = vmatpush.bf16.msra.mxu3 %v2433_v32 }
  0x2d   :  { %766 = vmatpush.bf16.msrb.mxu1 %v2459_v63  ;;  %323 = vmatpush.bf16.msra.mxu2 %v1845_v27 }
  0x2e   :  { %754 = vmatpush.bf16.msrb.mxu0 %v2441_v41 }
  0x2f   :  { %595 = vmatpush.bf16.msra.mxu3 %v2439_v38 }
  0x30   :  { %1874 = vmatmul.msk.bf16.vlgmr.msra.gmra.mxu2 %vm193_vm0, %v2421_v23  ;;  %v2012_v23 = vld [vmem:[#allocation4 + $0x10] sm:$0xff] }
  0x31   :  { %767 = vmatpush.bf16.msrb.mxu1 %v2468_v7  ;;  %885 = vmatpush.bf16.msrb.mxu2 %v2408_v3 }
  0x32   :  { %755 = vmatpush.bf16.msrb.mxu0 %v2447_v48 }
  0x33   :  { %596 = vmatpush.bf16.msra.mxu3 %v2445_v47  ;;  %1859 = vmatmul.msk.bf16.gmra.mxu0 %vm193_vm0, %v2011_v39 }
  0x35   :  { %768 = vmatpush.bf16.msrb.mxu1 %v2475_v12  ;;  %886 = vmatpush.bf16.msrb.mxu2 %v2411_v5 }
  0x36   :  { %597 = vmatmul.bf16.vlgmr.msra.gmra.mxu3 %v2361_v62  ;;  %756 = vmatpush.bf16.msrb.mxu0 %v2454_v57 }
  0x37   :  { %603 = vmatpush.bf16.msrb.mxu3 %v2419_v22 }
  0x38   :  { %1867 = vmatmul.msk.bf16.gmra.mxu1 %vm193_vm0, %v2011_v39 }
  0x39   :  { %769 = vmatpush.bf16.msrb.mxu1 %v2480_v18  ;;  %887 = vmatpush.bf16.msrb.mxu2 %v2414_v10 }
  0x3a   :  { %757 = vmatpush.bf16.msrb.mxu0 %v2464_v0 }
  0x3b   :  { %604 = vmatpush.bf16.msrb.mxu3 %v2427_v29 }
  0x3d   :  { %770 = vmatpush.bf16.msrb.mxu1 %v2485_v28  ;;  %888 = vmatpush.bf16.msrb.mxu2 %v2417_v19 }
  0x3e   :  { %758 = vmatpush.bf16.msrb.mxu0 %v2471_v8 }
  0x3f   :  { %605 = vmatpush.bf16.msrb.mxu3 %v2435_v35 }
  0x40   :  { %1875 = vmatmul.msk.bf16.gmra.mxu2 %vm193_vm0, %v2011_v39 }
  0x41   :  { %771 = vmatpush.bf16.msrb.mxu1 %v2493_v33  ;;  %889 = vmatpush.bf16.msrb.mxu2 %v2425_v26 }
  0x42   :  { %913 = vmatpush.bf16.msra.mxu0 %v2451_v56 }
  0x43   :  { %606 = vmatpush.bf16.msrb.mxu3 %v2441_v41  ;;  %1860 = vmatmul.msk.bf16.gmra.mxu0 %vm193_vm0, %v2012_v23 }
  0x45   :  { %772 = vmatpush.bf16.msrb.mxu1 %v2499_v37  ;;  %890 = vmatpush.bf16.msrb.mxu2 %v2433_v32 }
  0x46   :  { %914 = vmatpush.bf16.msra.mxu0 %v2459_v63 }
  0x47   :  { %607 = vmatpush.bf16.msrb.mxu3 %v2447_v48 }
  0x48   :  { %1868 = vmatmul.msk.bf16.gmra.mxu1 %vm193_vm0, %v2012_v23 }
  0x49   :  { %1033 = vmatpush.bf16.msra.mxu1 %v2408_v3  ;;  %891 = vmatpush.bf16.msrb.mxu2 %v2439_v38 }
  0x4a   :  { %915 = vmatpush.bf16.msra.mxu0 %v2468_v7 }
  0x4b   :  { %608 = vmatpush.bf16.msrb.mxu3 %v2454_v57 }
  0x4d   :  { %1034 = vmatpush.bf16.msra.mxu1 %v2411_v5  ;;  %892 = vmatpush.bf16.msrb.mxu2 %v2445_v47 }
  0x4e   :  { %916 = vmatpush.bf16.msra.mxu0 %v2475_v12 }
  0x4f   :  { %609 = vmatpush.bf16.msrb.mxu3 %v2464_v0 }
  0x50   :  { %1876 = vmatmul.msk.bf16.gmra.mxu2 %vm193_vm0, %v2012_v23 }
  0x51   :  { %1035 = vmatpush.bf16.msra.mxu1 %v2414_v10  ;;  %1047 = vmatpush.bf16.msra.mxu2 %v2419_v22 }
  0x52   :  { %917 = vmatpush.bf16.msra.mxu0 %v2480_v18 }
  0x53   :  { %610 = vmatpush.bf16.msrb.mxu3 %v2471_v8  ;;  %1861 = vmatmul.msk.bf16.gmra.mxu0 %vm193_vm0, %v2013_v40 }
  0x55   :  { %1036 = vmatpush.bf16.msra.mxu1 %v2417_v19  ;;  %1048 = vmatpush.bf16.msra.mxu2 %v2427_v29 }
  0x56   :  { %611 = vmatmul.bf16.vlgmr.msrb.gmra.mxu3 %v2361_v62  ;;  %918 = vmatpush.bf16.msra.mxu0 %v2485_v28 }
  0x57   :  { %617 = vmatpush.bf16.msra.mxu3 %v2451_v56 }
  0x58   :  { %1869 = vmatmul.msk.bf16.gmra.mxu1 %vm193_vm0, %v2013_v40 }
  0x59   :  { %1037 = vmatpush.bf16.msra.mxu1 %v2425_v26  ;;  %1049 = vmatpush.bf16.msra.mxu2 %v2435_v35 }
  0x5a   :  { %919 = vmatpush.bf16.msra.mxu0 %v2493_v33 }
  0x5b   :  { %618 = vmatpush.bf16.msra.mxu3 %v2459_v63 }
  0x5d   :  { %1038 = vmatpush.bf16.msra.mxu1 %v2433_v32  ;;  %1050 = vmatpush.bf16.msra.mxu2 %v2441_v41 }
  0x5e   :  { %920 = vmatpush.bf16.msra.mxu0 %v2499_v37 }
  0x5f   :  { %619 = vmatpush.bf16.msra.mxu3 %v2468_v7 }
  0x60   :  { %1877 = vmatmul.msk.bf16.gmra.mxu2 %vm193_vm0, %v2013_v40 }
  0x61   :  { %1039 = vmatpush.bf16.msra.mxu1 %v2439_v38  ;;  %1051 = vmatpush.bf16.msra.mxu2 %v2447_v48 }
  0x63   :  { %620 = vmatpush.bf16.msra.mxu3 %v2475_v12  ;;  %1862 = vmatmul.msk.bf16.gmra.mxu0 %vm193_vm0, %v2014_v42 }
  0x65   :  { %1040 = vmatpush.bf16.msra.mxu1 %v2445_v47  ;;  %1052 = vmatpush.bf16.msra.mxu2 %v2454_v57 }
  0x67   :  { %621 = vmatpush.bf16.msra.mxu3 %v2480_v18 }
  0x68   :  { %1870 = vmatmul.msk.bf16.gmra.mxu1 %vm193_vm0, %v2014_v42 }
  0x69   :  { %1053 = vmatpush.bf16.msra.mxu2 %v2464_v0 }
  0x6b   :  { %622 = vmatpush.bf16.msra.mxu3 %v2485_v28 }
  0x6d   :  { %1054 = vmatpush.bf16.msra.mxu2 %v2471_v8 }
  0x6f   :  { %623 = vmatpush.bf16.msra.mxu3 %v2493_v33 }
  0x70   :  { %1878 = vmatmul.msk.bf16.gmra.mxu2 %vm193_vm0, %v2014_v42 }
  0x73   :  { %624 = vmatpush.bf16.msra.mxu3 %v2499_v37  ;;  %1863 = vmatmul.msk.bf16.gmra.mxu0 %vm193_vm0, %v2015_v46 }
  0x76   :  { %625 = vmatmul.bf16.vlgmr.msra.gmra.mxu3 %v2361_v62 }
  0x77   :  { %737 = vmatpush.bf16.msrb.mxu3 %v2408_v3 }
  0x78   :  { %1871 = vmatmul.msk.bf16.gmra.mxu1 %vm193_vm0, %v2015_v46 }
  0x7b   :  { %738 = vmatpush.bf16.msrb.mxu3 %v2411_v5 }
  0x7f   :  { %739 = vmatpush.bf16.msrb.mxu3 %v2414_v10 }
  0x80   :  { %1879 = vmatmul.msk.bf16.gmra.mxu2 %vm193_vm0, %v2015_v46 }
  0x83   :  { %740 = vmatpush.bf16.msrb.mxu3 %v2417_v19  ;;  %1864 = vmatmul.msk.bf16.gmra.mxu0 %vm193_vm0, %v2016_v59 }
  0x87   :  { %741 = vmatpush.bf16.msrb.mxu3 %v2425_v26 }
  0x88   :  { %1872 = vmatmul.msk.bf16.gmra.mxu1 %vm193_vm0, %v2016_v59 }
  0x8b   :  { %742 = vmatpush.bf16.msrb.mxu3 %v2433_v32 }
  0x8f   :  { %743 = vmatpush.bf16.msrb.mxu3 %v2439_v38 }
  0x90   :  { %1880 = vmatmul.msk.bf16.gmra.mxu2 %vm193_vm0, %v2016_v59 }
  0x93   :  { %744 = vmatpush.bf16.msrb.mxu3 %v2445_v47  ;;  %1865 = vmatmul.msk.bf16.gmra.mxu0 %vm193_vm0, %v2017_v17 }
  0x97   :  { %899 = vmatpush.bf16.msra.mxu3 %v2419_v22 }
  0x98   :  { %1873 = vmatmul.msk.bf16.gmra.mxu1 %vm193_vm0, %v2017_v17 }
  0x9b   :  { %900 = vmatpush.bf16.msra.mxu3 %v2427_v29 }
  0x9e   :  { %v227_v44 = vpop.f32.mrf.mxu0 }
  0x9f   :  { %901 = vmatpush.bf16.msra.mxu3 %v2435_v35  ;;  %v228_v50 = vadd.f32 %v227_v44, %v2570_v45 }
  0xa0   :  { %1881 = vmatmul.msk.bf16.gmra.mxu2 %vm193_vm0, %v2017_v17 }
  0xa3   :  { %902 = vmatpush.bf16.msra.mxu3 %v2441_v41 }
  0xa5   :  { %v276_v60 = vpop.f32.mrf.mxu1 }
  0xa6   :  { %v229_v52 = vpop.f32.mrf.mxu0  ;;  %v277_v2 = vadd.f32 %v276_v60, %v2578_v61  ;;  %v2608_v60 = vperm.slane %v2567_v43, 2 }
  0xa7   :  { %903 = vmatpush.bf16.msra.mxu3 %v2447_v48  ;;  %v230_v54 = vadd.f32 %v229_v52, %v2570_v45 }
  0xab   :  { %904 = vmatpush.bf16.msra.mxu3 %v2454_v57 }
  0xad   :  { %v278_v11 = vpop.f32.mrf.mxu1 }
  0xae   :  { %v279_v15 = vadd.f32 %v278_v11, %v2578_v61 }
  0xaf   :  { %905 = vmatpush.bf16.msra.mxu3 %v2464_v0 }
  0xb3   :  { %906 = vmatpush.bf16.msra.mxu3 %v2471_v8 }
  0xb9   :  { %v598_v49 = vpop.f32.mrf.mxu3 }
  0xba   :  { %v631_v51 = vadd.f32 %v598_v49, %v228_v50 }
  0xbc   :  { %v1978_v53 = vmul.f32 -1.442695, %v631_v51 }
  0xbe   :  { %2064 = vpow2.f32 %v1978_v53 }
  0xc1   :  { %v600_v55 = vpop.f32.mrf.mxu3 }
  0xc2   :  { %v632_v58 = vadd.f32 %v600_v55, %v230_v54  ;;  %v2605_v54 = vld [vmem:[%s3085_s4] ss:$0 sm:$0xff]  ;;  %v325_v55 = vpop.f32.mrf.mxu2 }
  0xc4   :  { %v1979_v62 = vmul.f32 -1.442695, %v632_v58  ;;  %v2065_v1 = vpop.eup %2064 }
  0xc5   :  { %v639_v4 = vadd.f32 1.0, %v2065_v1 }
  0xc6   :  { %2066 = vpow2.f32 %v1979_v62 }
  0xc7   :  { %2068 = vrcp.f32 %v639_v4  ;;  %vm646_vm1 = vweird.f32 %v639_v4  ;;  %v652_v46 = vand.u32 2147483648, %v639_v4  ;;  %v650_v50 = vand.u32 2147483647, %v639_v4 }
  0xc9   :  { %v653_v58 = vor.u32 1.1754944e-38, %v652_v46  ;;  %vm651_vm4 = vcmp.eq.f32.partialorder %v650_v50, 8.507059e+37 }
  0xcc   :  { %v2067_v14 = vpop.eup %2066 }
  0xcd   :  { %v640_v16 = vadd.f32 1.0, %v2067_v14  ;;  %v2069_v21 = vpop.eup %2068 }
  0xce   :  { %v642_v31 = vmul.f32 %v2069_v21, %v639_v4  ;;  %vm647_vm2 = vweird.f32 %v2069_v21 }
  0xcf   :  { %vm2598_vm3 = vmor %vm646_vm1, %vm647_vm2  ;;  %vm661_vm5 = vweird.f32 %v640_v16  ;;  %v667_v14 = vand.u32 2147483648, %v640_v16 }
  0xd0   :  { %v643_v34 = vsub.f32 1.0, %v642_v31 }
  0xd2   :  { %v644_v40 = vmul.f32 %v2069_v21, %v643_v34  ;;  %v327_v34 = vpop.f32.mrf.mxu2 }
  0xd4   :  { %v645_v49 = vadd.f32 %v2069_v21, %v644_v40 }
  0xd6   :  { %v649_v62 = vsel %vm2598_vm3, %v2069_v21, %v645_v49 }
  0xd9   :  { %v612_v6 = vpop.f32.mrf.mxu3 }
  0xda   :  { %v671_v9 = vadd.f32 %v612_v6, %v277_v2 }
  0xdc   :  { %v1980_v13 = vmul.f32 -1.442695, %v671_v9 }
  0xde   :  { %2070 = vpow2.f32 %v1980_v13  ;;  %v654_v13 = vsel %vm651_vm4, %v653_v58, %v649_v62 }
  0xdf   :  { %2072 = vrcp.f32 %v640_v16 }
  0xe1   :  { %v614_v20 = vpop.f32.mrf.mxu3 }
  0xe2   :  { %v672_v24 = vadd.f32 %v614_v20, %v279_v15  ;;  %v326_v15 = vadd.f32 %v325_v55, %v2608_v60  ;;  %v665_v20 = vand.u32 2147483647, %v640_v16 }
  0xe4   :  { %v2071_v25 = vpop.eup %2070  ;;  %v1981_v27 = vmul.f32 -1.442695, %v672_v24  ;;  %vm666_vm8 = vcmp.eq.f32.partialorder %v665_v20, 8.507059e+37 }
  0xe5   :  { %v2588_v30 = vadd.f32 1.0, %v2071_v25  ;;  %v2073_v36 = vpop.eup %2072  ;;  %v668_v25 = vor.u32 1.1754944e-38, %v667_v14 }
  0xe6   :  { %2074 = vpow2.f32 %v1981_v27  ;;  %v657_v42 = vmul.f32 %v2073_v36, %v640_v16  ;;  %vm662_vm6 = vweird.f32 %v2073_v36 }
  0xe7   :  { %2076 = vrcp.f32 %v2588_v30  ;;  %vm663_vm7 = vmor %vm661_vm5, %vm662_vm6  ;;  %vm686_vm9 = vweird.f32 %v2588_v30  ;;  %v690_v49 = vand.u32 2147483647, %v2588_v30 }
  0xe8   :  { %v658_v51 = vsub.f32 1.0, %v657_v42  ;;  %v692_v42 = vand.u32 2147483648, %v2588_v30 }
  0xe9   :  { %vm691_vm15 = vcmp.eq.f32.partialorder %v690_v49, 8.507059e+37 }
  0xea   :  { %v659_v1 = vmul.f32 %v2073_v36, %v658_v51 }
  0xec   :  { %v2075_v39 = vpop.eup %2074  ;;  %v660_v17 = vadd.f32 %v2073_v36, %v659_v1  ;;  %v2633_v1 = vpop.f32.mrf.mxu0 }
  0xed   :  { %v2591_v23 = vadd.f32 1.0, %v2075_v39  ;;  %v2593_v44 = vpop.eup %2076 }
  0xee   :  { %v682_v52 = vmul.f32 %v2593_v44, %v2588_v30  ;;  %v664_v31 = vsel %vm663_vm7, %v2073_v36, %v660_v17  ;;  %vm687_vm10 = vweird.f32 %v2593_v44  ;;  %v693_v30 = vor.u32 1.1754944e-38, %v692_v42 }
  0xef   :  { %2078 = vrcp.f32 %v2591_v23  ;;  %v669_v46 = vsel %vm666_vm8, %v668_v25, %v664_v31  ;;  %vm2622_vm12 = vmor %vm686_vm9, %vm687_vm10  ;;  %v707_v51 = vand.u32 2147483648, %v2591_v23  ;;  %vm701_vm13 = vweird.f32 %v2591_v23 }
  0xf0   :  { %v683_v2 = vsub.f32 1.0, %v682_v52  ;;  %v328_v52 = vadd.f32 %v327_v34, %v2608_v60  ;;  %v705_v58 = vand.u32 2147483647, %v2591_v23 }
  0xf2   :  { %v684_v21 = vmul.f32 %v2593_v44, %v683_v2  ;;  %vm706_vm0 = vcmp.eq.f32.partialorder %v705_v58, 8.507059e+37 }
  0xf4   :  { %v685_v40 = vadd.f32 %v2593_v44, %v684_v21  ;;  %v2635_v20 = vpop.f32.mrf.mxu0 }
  0xf5   :  { %v2079_v59 = vpop.eup %2078 }
  0xf6   :  { %v697_v4 = vmul.f32 %v2079_v59, %v2591_v23  ;;  %vm702_vm11 = vweird.f32 %v2079_v59  ;;  %v689_v55 = vsel %vm2622_vm12, %v2593_v44, %v685_v40 }
  0xf7   :  { %vm703_vm14 = vmor %vm701_vm13, %vm702_vm11 }
  0xf8   :  { %v698_v11 = vsub.f32 1.0, %v697_v4  ;;  %v708_v4 = vor.u32 1.1754944e-38, %v707_v51 }
  0xf9   :  { %v626_v6 = vpop.f32.mrf.mxu3 }
  0xfa   :  { %v711_v9 = vadd.f32 %v2605_v54, %v626_v6  ;;  %v699_v24 = vmul.f32 %v2079_v59, %v698_v11  ;;  %v694_v6 = vsel %vm691_vm15, %v693_v30, %v689_v55 }
  0xfb   :  { %v723_v17 = vmul.f32 0.0, %v694_v6 }
  0xfc   :  { %v713_v43 = vmul.f32 %v711_v9, %v654_v13  ;;  %v700_v50 = vadd.f32 %v2079_v59, %v699_v24  ;;  %v719_v13 = vsub.f32 1.0, %v694_v6  ;;  %v2646_v25 = vpop.f32.mrf.mxu0 }
  0xfe   :  { %v715_v27 = vadd.f32 %v713_v43, %v326_v15  ;;  %v704_v2 = vsel %vm703_vm14, %v2079_v59, %v700_v50 }
  0xff   :  { %v709_v11 = vsel %vm706_vm0, %v708_v4, %v704_v2 }
 0x100   :  { %2080 = vtanh.f32 %v715_v27  ;;  %v720_v14 = vsub.f32 1.0, %v709_v11  ;;  %v724_v23 = vmul.f32 0.0, %v709_v11  ;;  %v281_v27 = vpop.f32.mrf.mxu1 }
 0x101   :  { %v628_v39 = vpop.f32.mrf.mxu3  ;;  %v282_v11 = vadd.f32 %v281_v27, %v2578_v61 }
 0x102   :  { %v712_v16 = vadd.f32 %v2605_v54, %v628_v39 }
 0x104   :  { %v714_v53 = vmul.f32 %v712_v16, %v669_v46  ;;  %v2657_v31 = vpop.f32.mrf.mxu0 }
 0x106   :  { %v716_v62 = vadd.f32 %v714_v53, %v328_v52  ;;  %v2081_v9 = vpop.eup %2080 }
 0x107   :  { %v721_v15 = vmul.f32 %v2081_v9, %v719_v13 }
 0x108   :  { %2082 = vtanh.f32 %v716_v62  ;;  %v283_v34 = vpop.f32.mrf.mxu1 }
 0x109   :  { %v2637_v21 = vadd.f32 %v723_v17, %v721_v15 }
 0x10c   :  { %v2665_v39 = vpop.f32.mrf.mxu0 }
 0x10e   :  { %v2083_v43 = vpop.eup %2082 }
 0x10f   :  { %v722_v44 = vmul.f32 %v2083_v43, %v720_v14 }
 0x110   :  { %v2673_v40 = vpop.f32.mrf.mxu1 }
 0x111   :  { %v2639_v24 = vadd.f32 %v724_v23, %v722_v44  ;;  %v233_v44 = vadd.f32 %v2633_v1, %v2570_v45  ;;  %v284_v23 = vadd.f32 %v283_v34, %v2578_v61 }
 0x113   :  { %v736_v59 = vpack.c.bf16 %v2639_v24, %v2637_v21 }
 0x114   :  { %v2675_v42 = vpop.f32.mrf.mxu0 }
 0x115   :  { %745 = vmatmul.bf16.vlgmr.msrb.gmra.mxu3 %v736_v59  ;;  %759 = vmatmul.bf16.vlgmr.msrb.gmra.mxu0 %v736_v59  ;;  %3091 = vst [vmem:[#allocation17_spill] sm:$0xff] %v2675_v42 }
 0x116   :  { %773 = vmatmul.bf16.vlgmr.msrb.gmra.mxu1 %v736_v59  ;;  %1061 = vmatpush.bf16.msrb.mxu3 %v2451_v56 }
 0x117   :  { %1181 = vmatpush.bf16.msrb.mxu0 %v2408_v3  ;;  %1195 = vmatpush.bf16.msrb.mxu1 %v2419_v22 }
 0x118   :  { %v2677_v16 = vpop.f32.mrf.mxu1 }
 0x11a   :  { %1062 = vmatpush.bf16.msrb.mxu3 %v2459_v63 }
 0x11b   :  { %1182 = vmatpush.bf16.msrb.mxu0 %v2411_v5  ;;  %1196 = vmatpush.bf16.msrb.mxu1 %v2427_v29 }
 0x11c   :  { %v2679_v46 = vpop.f32.mrf.mxu0 }
 0x11d   :  { %3092 = vst [vmem:[#allocation18_spill] sm:$0xff] %v2679_v46 }
 0x11e   :  { %1063 = vmatpush.bf16.msrb.mxu3 %v2468_v7 }
 0x11f   :  { %1183 = vmatpush.bf16.msrb.mxu0 %v2414_v10  ;;  %1197 = vmatpush.bf16.msrb.mxu1 %v2435_v35 }
 0x120   :  { %v2681_v49 = vpop.f32.mrf.mxu1 }
 0x122   :  { %1064 = vmatpush.bf16.msrb.mxu3 %v2475_v12 }
 0x123   :  { %1184 = vmatpush.bf16.msrb.mxu0 %v2417_v19  ;;  %1198 = vmatpush.bf16.msrb.mxu1 %v2441_v41 }
 0x124   :  { %v2683_v50 = vpop.f32.mrf.mxu0 }
 0x125   :  { %3093 = vst [vmem:[#allocation19_spill] sm:$0xff] %v2683_v50 }
 0x126   :  { %1065 = vmatpush.bf16.msrb.mxu3 %v2480_v18 }
 0x127   :  { %1185 = vmatpush.bf16.msrb.mxu0 %v2425_v26  ;;  %1199 = vmatpush.bf16.msrb.mxu1 %v2447_v48 }
 0x128   :  { %v2685_v36 = vpop.f32.mrf.mxu1 }
 0x129   :  { %3094 = vst [vmem:[#allocation20_spill] sm:$0xff] %v2685_v36 }
 0x12a   :  { %1066 = vmatpush.bf16.msrb.mxu3 %v2485_v28 }
 0x12b   :  { %1186 = vmatpush.bf16.msrb.mxu0 %v2433_v32  ;;  %1200 = vmatpush.bf16.msrb.mxu1 %v2454_v57 }
 0x12c   :  { %v2687_v51 = vpop.f32.mrf.mxu0 }
 0x12d   :  { %3095 = vst [vmem:[#allocation21_spill] sm:$0xff] %v2687_v51 }
 0x12e   :  { %1067 = vmatpush.bf16.msrb.mxu3 %v2493_v33 }
 0x12f   :  { %1187 = vmatpush.bf16.msrb.mxu0 %v2439_v38  ;;  %1201 = vmatpush.bf16.msrb.mxu1 %v2464_v0 }
 0x130   :  { %v2689_v52 = vpop.f32.mrf.mxu1 }
 0x131   :  { %3096 = vst [vmem:[#allocation22_spill] sm:$0xff] %v2689_v52 }
 0x132   :  { %1068 = vmatpush.bf16.msrb.mxu3 %v2499_v37 }
 0x133   :  { %1188 = vmatpush.bf16.msrb.mxu0 %v2445_v47  ;;  %1202 = vmatpush.bf16.msrb.mxu1 %v2471_v8 }
 0x134   :  { %v2691_v53 = vpop.f32.mrf.mxu0 }
 0x135   :  { %3097 = vst [vmem:[#allocation23_spill] sm:$0xff] %v2691_v53 }
 0x138   :  { %v2693_v55 = vpop.f32.mrf.mxu1 }
 0x139   :  { %3098 = vst [vmem:[#allocation24_spill] sm:$0xff] %v2693_v55 }
 0x13c   :  { %v2695_v58 = vpop.f32.mrf.mxu0 }
 0x13d   :  { %3099 = vst [vmem:[#allocation25_spill] sm:$0xff] %v2695_v58 }
 0x140   :  { %v2697_v30 = vpop.f32.mrf.mxu1 }
 0x141   :  { %3100 = vst [vmem:[#allocation26_spill] sm:$0xff] %v2697_v30 }
 0x144   :  { %v2699_v62 = vpop.f32.mrf.mxu0 }
 0x145   :  { %3101 = vst [vmem:[#allocation27_spill] sm:$0xff] %v2699_v62 }
 0x148   :  { %v2701_v2 = vpop.f32.mrf.mxu1 }
 0x149   :  { %3102 = vst [vmem:[#allocation28_spill] sm:$0xff] %v2701_v2 }
 0x14c   :  { %v2703_v4 = vpop.f32.mrf.mxu0 }
 0x14d   :  { %3103 = vst [vmem:[#allocation29_spill] sm:$0xff] %v2703_v4 }
 0x150   :  { %v2705_v6 = vpop.f32.mrf.mxu1 }
 0x151   :  { %3104 = vst [vmem:[#allocation30_spill] sm:$0xff] %v2705_v6 }
 0x154   :  { %v2707_v9 = vpop.f32.mrf.mxu0 }
 0x155   :  { %3105 = vst [vmem:[#allocation31_spill] sm:$0xff] %v2707_v9 }
 0x158   :  { %v2710_v13 = vpop.f32.mrf.mxu1 }
 0x159   :  { %3106 = vst [vmem:[#allocation32_spill] sm:$0xff] %v2710_v13 }
 0x160   :  { %v2715_v58 = vpop.f32.mrf.mxu1 }
 0x161   :  { %3107 = vst [vmem:[#allocation33_spill] sm:$0xff] %v2715_v58  ;;  %v330_v58 = vpop.f32.mrf.mxu2 }
 0x192   :  { %v760_v14 = vpop.f32.mrf.mxu0 }
 0x193   :  { %v819_v15 = vadd.f32 %v760_v14, %v282_v11  ;;  %v235_v11 = vadd.f32 %v2635_v20, %v2570_v45 }
 0x195   :  { %v1984_v43 = vmul.f32 -1.442695, %v819_v15 }
 0x197   :  { %2084 = vpow2.f32 %v1984_v43 }
 0x198   :  { %v746_v17 = vpop.f32.mrf.mxu3 }
 0x199   :  { %v779_v59 = vadd.f32 %v746_v17, %v233_v44 }
 0x19a   :  { %v762_v4 = vpop.f32.mrf.mxu0 }
 0x19b   :  { %v1982_v62 = vmul.f32 -1.442695, %v779_v59  ;;  %v820_v6 = vadd.f32 %v762_v4, %v284_v23  ;;  %v2722_v4 = vpop.f32.mrf.mxu1 }
 0x19c   :  { %3108 = vst [vmem:[#allocation34_spill] sm:$0xff] %v2722_v4 }
 0x19d   :  { %v2085_v9 = vpop.eup %2084  ;;  %2086 = vpow2.f32 %v1982_v62  ;;  %v1985_v27 = vmul.f32 -1.442695, %v820_v6 }
 0x19e   :  { %v2717_v13 = vadd.f32 1.0, %v2085_v9 }
 0x19f   :  { %2088 = vpow2.f32 %v1985_v27 }
 0x1a0   :  { %v748_v1 = vpop.f32.mrf.mxu3  ;;  %2090 = vrcp.f32 %v2717_v13  ;;  %vm834_vm6 = vweird.f32 %v2717_v13 }
 0x1a1   :  { %v780_v14 = vadd.f32 %v748_v1, %v235_v11 }
 0x1a3   :  { %v2087_v34 = vpop.eup %2086  ;;  %v1983_v15 = vmul.f32 -1.442695, %v780_v14  ;;  %v774_v14 = vpop.f32.mrf.mxu1 }
 0x1a4   :  { %v787_v43 = vadd.f32 1.0, %v2087_v34 }
 0x1a5   :  { %v2089_v44 = vpop.eup %2088  ;;  %2092 = vpow2.f32 %v1983_v15 }
 0x1a6   :  { %2094 = vrcp.f32 %v787_v43  ;;  %v2724_v62 = vadd.f32 1.0, %v2089_v44  ;;  %v2091_v6 = vpop.eup %2090  ;;  %v800_v34 = vand.u32 2147483648, %v787_v43  ;;  %v798_v44 = vand.u32 2147483647, %v787_v43 }
 0x1a7   :  { %v830_v20 = vmul.f32 %v2091_v6, %v2717_v13  ;;  %vm794_vm2 = vweird.f32 %v787_v43  ;;  %vm835_vm5 = vweird.f32 %v2091_v6 }
 0x1a8   :  { %2096 = vrcp.f32 %v2724_v62  ;;  %vm799_vm4 = vcmp.eq.f32.partialorder %v798_v44, 8.507059e+37  ;;  %vm2737_vm8 = vmor %vm834_vm6, %vm835_vm5  ;;  %vm849_vm14 = vweird.f32 %v2724_v62 }
 0x1a9   :  { %v831_v27 = vsub.f32 1.0, %v830_v20  ;;  %v801_v20 = vor.u32 1.1754944e-38, %v800_v34 }
 0x1ab   :  { %v2093_v9 = vpop.eup %2092  ;;  %v832_v53 = vmul.f32 %v2091_v6, %v831_v27  ;;  %v840_v27 = vand.u32 2147483648, %v2717_v13 }
 0x1ac   :  { %v2095_v17 = vpop.eup %2094  ;;  %v788_v23 = vadd.f32 1.0, %v2093_v9  ;;  %v859_v9 = vadd.f32 %v2605_v54, %v774_v14 }
 0x1ad   :  { %v790_v59 = vmul.f32 %v2095_v17, %v787_v43  ;;  %vm795_vm1 = vweird.f32 %v2095_v17  ;;  %v833_v52 = vadd.f32 %v2091_v6, %v832_v53  ;;  %v838_v43 = vand.u32 2147483647, %v2717_v13 }
 0x1ae   :  { %2098 = vrcp.f32 %v788_v23  ;;  %v2728_v11 = vpop.eup %2096  ;;  %vm796_vm3 = vmor %vm794_vm2, %vm795_vm1  ;;  %v813_v42 = vand.u32 2147483647, %v788_v23  ;;  %vm809_vm9 = vweird.f32 %v788_v23 }
 0x1af   :  { %v791_v1 = vsub.f32 1.0, %v790_v59  ;;  %v845_v4 = vmul.f32 %v2728_v11, %v2724_v62  ;;  %v331_v59 = vadd.f32 %v330_v58, %v2608_v60  ;;  %vm839_vm11 = vcmp.eq.f32.partialorder %v838_v43, 8.507059e+37 }
 0x1b0   :  { %vm814_vm12 = vcmp.eq.f32.partialorder %v813_v42, 8.507059e+37  ;;  %vm850_vm13 = vweird.f32 %v2728_v11 }
 0x1b1   :  { %v792_v15 = vmul.f32 %v2095_v17, %v791_v1  ;;  %v846_v1 = vsub.f32 1.0, %v845_v4  ;;  %v332_v4 = vpop.f32.mrf.mxu2  ;;  %vm851_vm15 = vmor %vm849_vm14, %vm850_vm13 }
 0x1b3   :  { %v793_v2 = vadd.f32 %v2095_v17, %v792_v15  ;;  %v815_v15 = vand.u32 2147483648, %v788_v23  ;;  %v847_v53 = vmul.f32 %v2728_v11, %v846_v1 }
 0x1b4   :  { %v2099_v51 = vpop.eup %2098 }
 0x1b5   :  { %v805_v30 = vmul.f32 %v2099_v51, %v788_v23  ;;  %v797_v55 = vsel %vm796_vm3, %v2095_v17, %v793_v2  ;;  %vm810_vm7 = vweird.f32 %v2099_v51  ;;  %v841_v2 = vor.u32 1.1754944e-38, %v840_v27 }
 0x1b6   :  { %v802_v50 = vsel %vm799_vm4, %v801_v20, %v797_v55  ;;  %v776_v55 = vpop.f32.mrf.mxu1  ;;  %vm811_vm10 = vmor %vm809_vm9, %vm810_vm7  ;;  %v855_v23 = vand.u32 2147483648, %v2724_v62  ;;  %v853_v20 = vand.u32 2147483647, %v2724_v62 }
 0x1b7   :  { %v861_v46 = vmul.f32 %v859_v9, %v802_v50  ;;  %v806_v36 = vsub.f32 1.0, %v805_v30  ;;  %v837_v50 = vsel %vm2737_vm8, %v2091_v6, %v833_v52  ;;  %v848_v9 = vadd.f32 %v2728_v11, %v847_v53 }
 0x1b8   :  { %v842_v17 = vsel %vm839_vm11, %v841_v2, %v837_v50  ;;  %v333_v52 = vadd.f32 %v332_v4, %v2608_v60  ;;  %v856_v43 = vor.u32 1.1754944e-38, %v855_v23  ;;  %vm854_vm0 = vcmp.eq.f32.partialorder %v853_v20, 8.507059e+37 }
 0x1b9   :  { %v863_v14 = vadd.f32 %v861_v46, %v331_v59  ;;  %v807_v34 = vmul.f32 %v2099_v51, %v806_v36  ;;  %v816_v46 = vor.u32 1.1754944e-38, %v815_v15  ;;  %v860_v36 = vadd.f32 %v2605_v54, %v776_v55 }
 0x1ba   :  { %v867_v59 = vsub.f32 1.0, %v842_v17  ;;  %v852_v42 = vsel %vm851_vm15, %v2728_v11, %v848_v9  ;;  %v871_v15 = vmul.f32 %v842_v17, %v2637_v21  ;;  %v2769_v21 = vpop.f32.mrf.mxu2  ;;  %v287_v23 = vadd.f32 %v2673_v40, %v2578_v61 }
 0x1bb   :  { %2100 = vtanh.f32 %v863_v14  ;;  %v808_v30 = vadd.f32 %v2099_v51, %v807_v34  ;;  %v857_v34 = vsel %vm854_vm0, %v856_v43, %v852_v42  ;;  %v289_v43 = vadd.f32 %v2677_v16, %v2578_v61 }
 0x1bc   :  { %v868_v58 = vsub.f32 1.0, %v857_v34  ;;  %v872_v62 = vmul.f32 %v857_v34, %v2639_v24 }
 0x1bd   :  { %v812_v13 = vsel %vm811_vm10, %v2099_v51, %v808_v30 }
 0x1be   :  { %v817_v44 = vsel %vm814_vm12, %v816_v46, %v812_v13 }
 0x1bf   :  { %v862_v6 = vmul.f32 %v860_v36, %v817_v44 }
 0x1c1   :  { %v2101_v1 = vpop.eup %2100  ;;  %v864_v27 = vadd.f32 %v862_v6, %v333_v52  ;;  %v238_v6 = vadd.f32 %v2646_v25, %v2570_v45 }
 0x1c2   :  { %v869_v51 = vmul.f32 %v2101_v1, %v867_v59  ;;  %v2780_v24 = vpop.f32.mrf.mxu2 }
 0x1c3   :  { %2102 = vtanh.f32 %v864_v27 }
 0x1c4   :  { %v2753_v14 = vadd.f32 %v871_v15, %v869_v51  ;;  %v240_v15 = vadd.f32 %v2657_v31, %v2570_v45 }
 0x1c9   :  { %v2103_v55 = vpop.eup %2102 }
 0x1ca   :  { %v870_v50 = vmul.f32 %v2103_v55, %v868_v58  ;;  %v2788_v11 = vpop.f32.mrf.mxu2 }
 0x1cc   :  { %v2756_v53 = vadd.f32 %v872_v62, %v870_v50 }
 0x1ce   :  { %v884_v30 = vpack.c.bf16 %v2756_v53, %v2753_v14 }
 0x1d0   :  { %893 = vmatmul.bf16.vlgmr.msrb.gmra.mxu2 %v884_v30  ;;  %907 = vmatmul.bf16.vlgmr.msra.gmra.mxu3 %v884_v30 }
 0x1d1   :  { %921 = vmatmul.bf16.vlgmr.msra.gmra.mxu0 %v884_v30  ;;  %1209 = vmatpush.bf16.msrb.mxu2 %v2451_v56 }
 0x1d2   :  { %1329 = vmatpush.bf16.msra.mxu3 %v2408_v3  ;;  %1343 = vmatpush.bf16.msra.mxu0 %v2419_v22  ;;  %v2790_v2 = vpop.f32.mrf.mxu2 }
 0x1d5   :  { %1210 = vmatpush.bf16.msrb.mxu2 %v2459_v63 }
 0x1d6   :  { %1330 = vmatpush.bf16.msra.mxu3 %v2411_v5  ;;  %1344 = vmatpush.bf16.msra.mxu0 %v2427_v29 }
 0x1d9   :  { %1211 = vmatpush.bf16.msrb.mxu2 %v2468_v7 }
 0x1da   :  { %1331 = vmatpush.bf16.msra.mxu3 %v2414_v10  ;;  %1345 = vmatpush.bf16.msra.mxu0 %v2435_v35  ;;  %v2792_v4 = vpop.f32.mrf.mxu2 }
 0x1dd   :  { %1212 = vmatpush.bf16.msrb.mxu2 %v2475_v12 }
 0x1de   :  { %1332 = vmatpush.bf16.msra.mxu3 %v2417_v19  ;;  %1346 = vmatpush.bf16.msra.mxu0 %v2441_v41 }
 0x1e1   :  { %1213 = vmatpush.bf16.msrb.mxu2 %v2480_v18 }
 0x1e2   :  { %1333 = vmatpush.bf16.msra.mxu3 %v2425_v26  ;;  %1347 = vmatpush.bf16.msra.mxu0 %v2447_v48  ;;  %v2794_v46 = vpop.f32.mrf.mxu2 }
 0x1e5   :  { %1214 = vmatpush.bf16.msrb.mxu2 %v2485_v28 }
 0x1e6   :  { %1334 = vmatpush.bf16.msra.mxu3 %v2433_v32  ;;  %1348 = vmatpush.bf16.msra.mxu0 %v2454_v57 }
 0x1e9   :  { %1215 = vmatpush.bf16.msrb.mxu2 %v2493_v33 }
 0x1ea   :  { %1335 = vmatpush.bf16.msra.mxu3 %v2439_v38  ;;  %1349 = vmatpush.bf16.msra.mxu0 %v2464_v0  ;;  %v2796_v36 = vpop.f32.mrf.mxu2 }
 0x1eb   :  { %3111 = vst [vmem:[#allocation35_spill] sm:$0xff] %v2796_v36 }
 0x1ed   :  { %1216 = vmatpush.bf16.msrb.mxu2 %v2499_v37 }
 0x1ee   :  { %1336 = vmatpush.bf16.msra.mxu3 %v2445_v47  ;;  %1350 = vmatpush.bf16.msra.mxu0 %v2471_v8 }
 0x1f2   :  { %v2798_v13 = vpop.f32.mrf.mxu2 }
 0x1f3   :  { %3112 = vst [vmem:[#allocation36_spill] sm:$0xff] %v2798_v13 }
 0x1fa   :  { %v2800_v17 = vpop.f32.mrf.mxu2 }
 0x1fb   :  { %3113 = vst [vmem:[#allocation37_spill] sm:$0xff] %v2800_v17 }
 0x202   :  { %v2802_v44 = vpop.f32.mrf.mxu2 }
 0x203   :  { %3114 = vst [vmem:[#allocation38_spill] sm:$0xff] %v2802_v44 }
 0x20a   :  { %v2804_v9 = vpop.f32.mrf.mxu2 }
 0x20b   :  { %3115 = vst [vmem:[#allocation39_spill] sm:$0xff] %v2804_v9 }
 0x212   :  { %v2806_v52 = vpop.f32.mrf.mxu2 }
 0x213   :  { %3116 = vst [vmem:[#allocation40_spill] sm:$0xff] %v2806_v52 }
 0x253   :  { %v894_v20 = vpop.f32.mrf.mxu2  ;;  %v908_v59 = vpop.f32.mrf.mxu3 }
 0x254   :  { %v927_v1 = vadd.f32 %v894_v20, %v238_v6  ;;  %v967_v27 = vadd.f32 %v908_v59, %v287_v23 }
 0x256   :  { %v1986_v42 = vmul.f32 -1.442695, %v927_v1  ;;  %v1988_v51 = vmul.f32 -1.442695, %v967_v27 }
 0x258   :  { %2104 = vpow2.f32 %v1986_v42 }
 0x259   :  { %2106 = vpow2.f32 %v1988_v51 }
 0x25b   :  { %v896_v34 = vpop.f32.mrf.mxu2  ;;  %v910_v58 = vpop.f32.mrf.mxu3 }
 0x25c   :  { %v928_v25 = vadd.f32 %v896_v34, %v240_v15  ;;  %v968_v55 = vadd.f32 %v910_v58, %v289_v43  ;;  %v922_v43 = vpop.f32.mrf.mxu0 }
 0x25e   :  { %v2105_v50 = vpop.eup %2104  ;;  %v1987_v40 = vmul.f32 -1.442695, %v928_v25  ;;  %v1989_v6 = vmul.f32 -1.442695, %v968_v55 }
 0x25f   :  { %v2107_v62 = vpop.eup %2106  ;;  %v935_v30 = vadd.f32 1.0, %v2105_v50 }
 0x260   :  { %v975_v23 = vadd.f32 1.0, %v2107_v62  ;;  %2108 = vpow2.f32 %v1987_v40 }
 0x261   :  { %2110 = vrcp.f32 %v935_v30  ;;  %v948_v34 = vand.u32 2147483648, %v935_v30  ;;  %v946_v55 = vand.u32 2147483647, %v935_v30  ;;  %vm942_vm2 = vweird.f32 %v935_v30 }
 0x262   :  { %2112 = vrcp.f32 %v975_v23  ;;  %v988_v17 = vand.u32 2147483648, %v975_v23  ;;  %vm982_vm6 = vweird.f32 %v975_v23 }
 0x263   :  { %2114 = vpow2.f32 %v1989_v6  ;;  %v949_v6 = vor.u32 1.1754944e-38, %v948_v34  ;;  %vm947_vm4 = vcmp.eq.f32.partialorder %v946_v55, 8.507059e+37  ;;  %v986_v34 = vand.u32 2147483647, %v975_v23 }
 0x265   :  { %vm987_vm11 = vcmp.eq.f32.partialorder %v986_v34, 8.507059e+37 }
 0x266   :  { %v2109_v20 = vpop.eup %2108 }
 0x267   :  { %v2111_v59 = vpop.eup %2110  ;;  %v936_v31 = vadd.f32 1.0, %v2109_v20  ;;  %v1007_v20 = vadd.f32 %v2605_v54, %v922_v43 }
 0x268   :  { %v2113_v1 = vpop.eup %2112  ;;  %v938_v27 = vmul.f32 %v2111_v59, %v935_v30  ;;  %vm943_vm1 = vweird.f32 %v2111_v59 }
 0x269   :  { %v2115_v16 = vpop.eup %2114  ;;  %v978_v42 = vmul.f32 %v2113_v1, %v975_v23  ;;  %2116 = vrcp.f32 %v936_v31  ;;  %vm944_vm3 = vmor %vm942_vm2, %vm943_vm1  ;;  %vm983_vm5 = vweird.f32 %v2113_v1  ;;  %v963_v30 = vand.u32 2147483648, %v936_v31 }
 0x26a   :  { %v939_v51 = vsub.f32 1.0, %v938_v27  ;;  %v2816_v15 = vadd.f32 1.0, %v2115_v16  ;;  %vm2823_vm7 = vmor %vm982_vm6, %vm983_vm5  ;;  %vm957_vm9 = vweird.f32 %v936_v31 }
 0x26b   :  { %v979_v58 = vsub.f32 1.0, %v978_v42 }
 0x26c   :  { %v940_v25 = vmul.f32 %v2111_v59, %v939_v51  ;;  %2118 = vrcp.f32 %v2816_v15  ;;  %v336_v51 = vadd.f32 %v2769_v21, %v2608_v60  ;;  %vm997_vm14 = vweird.f32 %v2816_v15 }
 0x26d   :  { %v980_v50 = vmul.f32 %v2113_v1, %v979_v58 }
 0x26e   :  { %v941_v40 = vadd.f32 %v2111_v59, %v940_v25 }
 0x26f   :  { %v2117_v62 = vpop.eup %2116  ;;  %v981_v9 = vadd.f32 %v2113_v1, %v980_v50  ;;  %v924_v50 = vpop.f32.mrf.mxu0 }
 0x270   :  { %v945_v52 = vsel %vm944_vm3, %v2111_v59, %v941_v40  ;;  %v953_v27 = vmul.f32 %v2117_v62, %v936_v31  ;;  %vm958_vm8 = vweird.f32 %v2117_v62 }
 0x271   :  { %v950_v16 = vsel %vm947_vm4, %v949_v6, %v945_v52  ;;  %v961_v52 = vand.u32 2147483647, %v936_v31  ;;  %v985_v21 = vsel %vm2823_vm7, %v2113_v1, %v981_v9  ;;  %v989_v6 = vor.u32 1.1754944e-38, %v988_v17  ;;  %vm959_vm10 = vmor %vm957_vm9, %vm958_vm8 }
 0x272   :  { %v2119_v42 = vpop.eup %2118  ;;  %v1009_v44 = vmul.f32 %v1007_v20, %v950_v16  ;;  %v954_v58 = vsub.f32 1.0, %v953_v27  ;;  %v964_v27 = vor.u32 1.1754944e-38, %v963_v30  ;;  %v1008_v16 = vadd.f32 %v2605_v54, %v924_v50 }
 0x273   :  { %v993_v25 = vmul.f32 %v2119_v42, %v2816_v15  ;;  %vm962_vm12 = vcmp.eq.f32.partialorder %v961_v52, 8.507059e+37  ;;  %vm998_vm13 = vweird.f32 %v2119_v42  ;;  %v1003_v17 = vand.u32 2147483648, %v2816_v15 }
 0x274   :  { %v955_v59 = vmul.f32 %v2117_v62, %v954_v58  ;;  %v1011_v55 = vadd.f32 %v1009_v44, %v336_v51  ;;  %v990_v58 = vsel %vm987_vm11, %v989_v6, %v985_v21  ;;  %v338_v51 = vadd.f32 %v2780_v24, %v2608_v60  ;;  %vm999_vm15 = vmor %vm997_vm14, %vm998_vm13 }
 0x275   :  { %v994_v40 = vsub.f32 1.0, %v993_v25  ;;  %v1001_v31 = vand.u32 2147483647, %v2816_v15  ;;  %v1015_v1 = vsub.f32 1.0, %v990_v58  ;;  %v1004_v43 = vor.u32 1.1754944e-38, %v1003_v17 }
 0x276   :  { %v956_v20 = vadd.f32 %v2117_v62, %v955_v59  ;;  %2120 = vtanh.f32 %v1011_v55  ;;  %v292_v6 = vadd.f32 %v2681_v49, %v2578_v61 }
 0x277   :  { %v995_v23 = vmul.f32 %v2119_v42, %v994_v40  ;;  %vm1002_vm0 = vcmp.eq.f32.partialorder %v1001_v31, 8.507059e+37 }
 0x278   :  { %v960_v13 = vsel %vm959_vm10, %v2117_v62, %v956_v20 }
 0x279   :  { %v965_v36 = vsel %vm962_vm12, %v964_v27, %v960_v13  ;;  %v996_v44 = vadd.f32 %v2119_v42, %v995_v23  ;;  %v1019_v13 = vmul.f32 %v990_v58, %v2753_v14  ;;  %v243_v14 = vadd.f32 %v2665_v39, %v2570_v45  ;;  %v3119_v27 = vld [vmem:[#allocation17_spill] sm:$0xff]  ;;  %v3120_v39 = vld [vmem:[#allocation20_spill] sm:$0xff] }
 0x27a   :  { %v1010_v9 = vmul.f32 %v1008_v16, %v965_v36  ;;  %v245_v23 = vadd.f32 %v3119_v27, %v2570_v45 }
 0x27b   :  { %v1000_v62 = vsel %vm999_vm15, %v2119_v42, %v996_v44 }
 0x27c   :  { %v2121_v30 = vpop.eup %2120  ;;  %v1012_v25 = vadd.f32 %v1010_v9, %v338_v51  ;;  %v1005_v24 = vsel %vm1002_vm0, %v1004_v43, %v1000_v62 }
 0x27d   :  { %v1017_v34 = vmul.f32 %v2121_v30, %v1015_v1  ;;  %v1016_v36 = vsub.f32 1.0, %v1005_v24  ;;  %v1020_v50 = vmul.f32 %v1005_v24, %v2756_v53  ;;  %v294_v1 = vadd.f32 %v3120_v39, %v2578_v61 }
 0x27e   :  { %2122 = vtanh.f32 %v1012_v25  ;;  %v341_v39 = vadd.f32 %v2788_v11, %v2608_v60 }
 0x27f   :  { %v2836_v59 = vadd.f32 %v1019_v13, %v1017_v34 }
 0x284   :  { %v2123_v52 = vpop.eup %2122 }
 0x285   :  { %v1018_v55 = vmul.f32 %v2123_v52, %v1016_v36 }
 0x287   :  { %v2839_v15 = vadd.f32 %v1020_v50, %v1018_v55 }
 0x289   :  { %v1032_v40 = vpack.c.bf16 %v2839_v15, %v2836_v59 }
 0x28b   :  { %1041 = vmatmul.bf16.vlgmr.msra.gmra.mxu1 %v1032_v40  ;;  %1055 = vmatmul.bf16.vlgmr.msra.gmra.mxu2 %v1032_v40 }
 0x28c   :  { %1069 = vmatmul.bf16.vlgmr.msrb.gmra.mxu3 %v1032_v40  ;;  %1357 = vmatpush.bf16.msra.mxu1 %v2451_v56 }
 0x28d   :  { %1477 = vmatpush.bf16.msra.mxu2 %v2408_v3  ;;  %1491 = vmatpush.bf16.msrb.mxu3 %v2419_v22 }
 0x290   :  { %1358 = vmatpush.bf16.msra.mxu1 %v2459_v63 }
 0x291   :  { %1478 = vmatpush.bf16.msra.mxu2 %v2411_v5  ;;  %1492 = vmatpush.bf16.msrb.mxu3 %v2427_v29 }
 0x294   :  { %1359 = vmatpush.bf16.msra.mxu1 %v2468_v7 }
 0x295   :  { %1479 = vmatpush.bf16.msra.mxu2 %v2414_v10  ;;  %1493 = vmatpush.bf16.msrb.mxu3 %v2435_v35 }
 0x298   :  { %1360 = vmatpush.bf16.msra.mxu1 %v2475_v12 }
 0x299   :  { %1480 = vmatpush.bf16.msra.mxu2 %v2417_v19  ;;  %1494 = vmatpush.bf16.msrb.mxu3 %v2441_v41 }
 0x29c   :  { %1361 = vmatpush.bf16.msra.mxu1 %v2480_v18 }
 0x29d   :  { %1481 = vmatpush.bf16.msra.mxu2 %v2425_v26  ;;  %1495 = vmatpush.bf16.msrb.mxu3 %v2447_v48 }
 0x2a0   :  { %1362 = vmatpush.bf16.msra.mxu1 %v2485_v28 }
 0x2a1   :  { %1482 = vmatpush.bf16.msra.mxu2 %v2433_v32  ;;  %1496 = vmatpush.bf16.msrb.mxu3 %v2454_v57 }
 0x2a4   :  { %1363 = vmatpush.bf16.msra.mxu1 %v2493_v33 }
 0x2a5   :  { %1483 = vmatpush.bf16.msra.mxu2 %v2439_v38  ;;  %1497 = vmatpush.bf16.msrb.mxu3 %v2464_v0 }
 0x2a8   :  { %1364 = vmatpush.bf16.msra.mxu1 %v2499_v37 }
 0x2a9   :  { %1484 = vmatpush.bf16.msra.mxu2 %v2445_v47  ;;  %1498 = vmatpush.bf16.msrb.mxu3 %v2471_v8 }
 0x308   :  { %v1042_v53 = vpop.f32.mrf.mxu1 }
 0x309   :  { %v1075_v42 = vadd.f32 %v1042_v53, %v243_v14 }
 0x30b   :  { %v1990_v21 = vmul.f32 -1.442695, %v1075_v42 }
 0x30d   :  { %2124 = vpow2.f32 %v1990_v21 }
 0x30e   :  { %v1056_v20 = vpop.f32.mrf.mxu2 }
 0x30f   :  { %v1115_v16 = vadd.f32 %v1056_v20, %v292_v6  ;;  %v1070_v52 = vpop.f32.mrf.mxu3 }
 0x310   :  { %v1044_v58 = vpop.f32.mrf.mxu1 }
 0x311   :  { %v1992_v44 = vmul.f32 -1.442695, %v1115_v16  ;;  %v1076_v51 = vadd.f32 %v1044_v58, %v245_v23  ;;  %v1155_v16 = vadd.f32 %v2605_v54, %v1070_v52 }
 0x313   :  { %v2125_v9 = vpop.eup %2124  ;;  %2126 = vpow2.f32 %v1992_v44  ;;  %v1991_v17 = vmul.f32 -1.442695, %v1076_v51 }
 0x314   :  { %v1083_v31 = vadd.f32 1.0, %v2125_v9 }
 0x315   :  { %2128 = vpow2.f32 %v1991_v17 }
 0x316   :  { %2130 = vrcp.f32 %v1083_v31  ;;  %v1058_v30 = vpop.f32.mrf.mxu2  ;;  %v1096_v50 = vand.u32 2147483648, %v1083_v31  ;;  %v1094_v53 = vand.u32 2147483647, %v1083_v31  ;;  %vm1090_vm2 = vweird.f32 %v1083_v31 }
 0x317   :  { %v1116_v49 = vadd.f32 %v1058_v30, %v294_v1 }
 0x318   :  { %v1097_v23 = vor.u32 1.1754944e-38, %v1096_v50  ;;  %vm1095_vm4 = vcmp.eq.f32.partialorder %v1094_v53, 8.507059e+37 }
 0x319   :  { %v2127_v25 = vpop.eup %2126  ;;  %v1993_v62 = vmul.f32 -1.442695, %v1116_v49 }
 0x31a   :  { %v1123_v34 = vadd.f32 1.0, %v2127_v25 }
 0x31b   :  { %v2129_v13 = vpop.eup %2128  ;;  %2132 = vpow2.f32 %v1993_v62 }
 0x31c   :  { %v2131_v43 = vpop.eup %2130  ;;  %2134 = vrcp.f32 %v1123_v34  ;;  %v1084_v24 = vadd.f32 1.0, %v2129_v13  ;;  %v1136_v9 = vand.u32 2147483648, %v1123_v34  ;;  %v1134_v62 = vand.u32 2147483647, %v1123_v34 }
 0x31d   :  { %v1086_v36 = vmul.f32 %v2131_v43, %v1083_v31  ;;  %vm1091_vm1 = vweird.f32 %v2131_v43  ;;  %vm1130_vm7 = vweird.f32 %v1123_v34 }
 0x31e   :  { %2136 = vrcp.f32 %v1084_v24  ;;  %vm1092_vm3 = vmor %vm1090_vm2, %vm1091_vm1  ;;  %v1109_v31 = vand.u32 2147483647, %v1084_v24  ;;  %v1111_v25 = vand.u32 2147483648, %v1084_v24  ;;  %v1137_v50 = vor.u32 1.1754944e-38, %v1136_v9 }
 0x31f   :  { %v1087_v55 = vsub.f32 1.0, %v1086_v36  ;;  %v1072_v36 = vpop.f32.mrf.mxu3  ;;  %vm1105_vm9 = vweird.f32 %v1084_v24  ;;  %vm1135_vm11 = vcmp.eq.f32.partialorder %v1134_v62, 8.507059e+37 }
 0x320   :  { %v1156_v53 = vadd.f32 %v2605_v54, %v1072_v36  ;;  %vm1110_vm12 = vcmp.eq.f32.partialorder %v1109_v31, 8.507059e+37 }
 0x321   :  { %v2133_v40 = vpop.eup %2132  ;;  %v1088_v14 = vmul.f32 %v2131_v43, %v1087_v55 }
 0x322   :  { %v2135_v42 = vpop.eup %2134  ;;  %v2875_v21 = vadd.f32 1.0, %v2133_v40 }
 0x323   :  { %v1126_v6 = vmul.f32 %v2135_v42, %v1123_v34  ;;  %v1089_v20 = vadd.f32 %v2131_v43, %v1088_v14  ;;  %vm1131_vm5 = vweird.f32 %v2135_v42  ;;  %v1112_v14 = vor.u32 1.1754944e-38, %v1111_v25 }
 0x324   :  { %v2137_v27 = vpop.eup %2136  ;;  %2138 = vrcp.f32 %v2875_v21  ;;  %vm1132_vm8 = vmor %vm1130_vm7, %vm1131_vm5  ;;  %v343_v34 = vadd.f32 %v2790_v2, %v2608_v60  ;;  %vm1145_vm14 = vweird.f32 %v2875_v21 }
 0x325   :  { %v1127_v58 = vsub.f32 1.0, %v1126_v6  ;;  %v1093_v44 = vsel %vm1092_vm3, %v2131_v43, %v1089_v20  ;;  %v1101_v51 = vmul.f32 %v2137_v27, %v1084_v24  ;;  %vm1106_vm6 = vweird.f32 %v2137_v27 }
 0x326   :  { %v1098_v17 = vsel %vm1095_vm4, %v1097_v23, %v1093_v44  ;;  %vm1107_vm10 = vmor %vm1105_vm9, %vm1106_vm6  ;;  %v1149_v24 = vand.u32 2147483647, %v2875_v21 }
 0x327   :  { %v1128_v1 = vmul.f32 %v2135_v42, %v1127_v58  ;;  %v1157_v30 = vmul.f32 %v1155_v16, %v1098_v17  ;;  %v1102_v49 = vsub.f32 1.0, %v1101_v51  ;;  %v1151_v51 = vand.u32 2147483648, %v2875_v21 }
 0x328   :  { %vm1150_vm0 = vcmp.eq.f32.partialorder %v1149_v24, 8.507059e+37 }
 0x329   :  { %v1159_v13 = vadd.f32 %v1157_v30, %v341_v39  ;;  %v1103_v52 = vmul.f32 %v2137_v27, %v1102_v49  ;;  %v1129_v55 = vadd.f32 %v2135_v42, %v1128_v1  ;;  %v1152_v30 = vor.u32 1.1754944e-38, %v1151_v51 }
 0x32a   :  { %v2139_v43 = vpop.eup %2138 }
 0x32b   :  { %2140 = vtanh.f32 %v1159_v13  ;;  %v1141_v40 = vmul.f32 %v2139_v43, %v2875_v21  ;;  %v1104_v11 = vadd.f32 %v2137_v27, %v1103_v52  ;;  %v1133_v6 = vsel %vm1132_vm8, %v2135_v42, %v1129_v55 }
 0x32c   :  { %v1138_v16 = vsel %vm1135_vm11, %v1137_v50, %v1133_v6  ;;  %vm1146_vm13 = vweird.f32 %v2139_v43 }
 0x32d   :  { %v1142_v20 = vsub.f32 1.0, %v1141_v40  ;;  %v1108_v23 = vsel %vm1107_vm10, %v2137_v27, %v1104_v11  ;;  %v1163_v17 = vsub.f32 1.0, %v1138_v16  ;;  %vm1147_vm15 = vmor %vm1145_vm14, %vm1146_vm13  ;;  %v1167_v1 = vmul.f32 %v1138_v16, %v2836_v59 }
 0x32e   :  { %v1113_v58 = vsel %vm1110_vm12, %v1112_v14, %v1108_v23 }
 0x32f   :  { %v1143_v44 = vmul.f32 %v2139_v43, %v1142_v20  ;;  %v1158_v9 = vmul.f32 %v1156_v53, %v1113_v58 }
 0x331   :  { %v2141_v39 = vpop.eup %2140  ;;  %v1160_v54 = vadd.f32 %v1158_v9, %v343_v34  ;;  %v1144_v42 = vadd.f32 %v2139_v43, %v1143_v44 }
 0x332   :  { %v1165_v27 = vmul.f32 %v2141_v39, %v1163_v17 }
 0x333   :  { %2142 = vtanh.f32 %v1160_v54  ;;  %v1148_v2 = vsel %vm1147_vm15, %v2139_v43, %v1144_v42 }
 0x334   :  { %v2889_v49 = vadd.f32 %v1167_v1, %v1165_v27  ;;  %v1153_v31 = vsel %vm1150_vm0, %v1152_v30, %v1148_v2 }
 0x335   :  { %v1164_v25 = vsub.f32 1.0, %v1153_v31  ;;  %v1168_v36 = vmul.f32 %v1153_v31, %v2839_v15  ;;  %v2934_v31 = vld [vmem:[%s3085_s4] ss:$0 sm:$0xff]  ;;  %s2362_s4 = smov [#allocation12]  }
 0x336   :  { %s1778_s17 = sshll.u32 %s2362_s4, 4  ;;  %s1779_s17 = int_to_ptr.vmem [resolvable:$true] %s1778_s17 }
 0x339   :  { %v2143_v62 = vpop.eup %2142 }
 0x33a   :  { %v1166_v13 = vmul.f32 %v2143_v62, %v1164_v25 }
 0x33c   :  { %v2892_v52 = vadd.f32 %v1168_v36, %v1166_v13 }
 0x33e   :  { %v1180_v21 = vpack.c.bf16 %v2892_v52, %v2889_v49 }
 0x340   :  { %1189 = vmatmul.bf16.vlgmr.msrb.gmra.mxu0 %v1180_v21  ;;  %1203 = vmatmul.bf16.vlgmr.msrb.gmra.mxu1 %v1180_v21 }
 0x341   :  { %1217 = vmatmul.bf16.vlgmr.msrb.gmra.mxu2 %v1180_v21  ;;  %1505 = vmatpush.bf16.msrb.mxu0 %v2451_v56 }
 0x342   :  { %1625 = vmatpush.bf16.msrb.mxu1 %v2408_v3  ;;  %1639 = vmatpush.bf16.msrb.mxu2 %v2419_v22  ;;  %v3121_v3 = vld [vmem:[#allocation18_spill] sm:$0xff] }
 0x345   :  { %1506 = vmatpush.bf16.msrb.mxu0 %v2459_v63 }
 0x346   :  { %1626 = vmatpush.bf16.msrb.mxu1 %v2411_v5  ;;  %1640 = vmatpush.bf16.msrb.mxu2 %v2427_v29  ;;  %v248_v5 = vadd.f32 %v3121_v3, %v2570_v45  ;;  %v346_v3 = vadd.f32 %v2792_v4, %v2608_v60 }
 0x349   :  { %1507 = vmatpush.bf16.msrb.mxu0 %v2468_v7 }
 0x34a   :  { %1627 = vmatpush.bf16.msrb.mxu1 %v2414_v10  ;;  %1641 = vmatpush.bf16.msrb.mxu2 %v2435_v35  ;;  %v3122_v10 = vld [vmem:[#allocation22_spill] sm:$0xff] }
 0x34d   :  { %1508 = vmatpush.bf16.msrb.mxu0 %v2475_v12 }
 0x34e   :  { %1628 = vmatpush.bf16.msrb.mxu1 %v2417_v19  ;;  %1642 = vmatpush.bf16.msrb.mxu2 %v2441_v41  ;;  %v297_v19 = vadd.f32 %v3122_v10, %v2578_v61  ;;  %v3123_v41 = vld [vmem:[#allocation19_spill] sm:$0xff] }
 0x351   :  { %1509 = vmatpush.bf16.msrb.mxu0 %v2480_v18 }
 0x352   :  { %1629 = vmatpush.bf16.msrb.mxu1 %v2425_v26  ;;  %1643 = vmatpush.bf16.msrb.mxu2 %v2447_v48  ;;  %v250_v48 = vadd.f32 %v3123_v41, %v2570_v45 }
 0x355   :  { %1510 = vmatpush.bf16.msrb.mxu0 %v2485_v28 }
 0x356   :  { %1630 = vmatpush.bf16.msrb.mxu1 %v2433_v32  ;;  %1644 = vmatpush.bf16.msrb.mxu2 %v2454_v57 }
 0x359   :  { %1511 = vmatpush.bf16.msrb.mxu0 %v2493_v33 }
 0x35a   :  { %1631 = vmatpush.bf16.msrb.mxu1 %v2439_v38  ;;  %1645 = vmatpush.bf16.msrb.mxu2 %v2464_v0 }
 0x35d   :  { %1512 = vmatpush.bf16.msrb.mxu0 %v2499_v37 }
 0x35e   :  { %1632 = vmatpush.bf16.msrb.mxu1 %v2445_v47  ;;  %1646 = vmatpush.bf16.msrb.mxu2 %v2471_v8  ;;  %v3124_v47 = vld [vmem:[#allocation24_spill] sm:$0xff] }
 0x35f   :  { %v299_v57 = vadd.f32 %v3124_v47, %v2578_v61 }
 0x3bd   :  { %v1190_v22 = vpop.f32.mrf.mxu0  ;;  %v1204_v26 = vpop.f32.mrf.mxu1 }
 0x3be   :  { %v1223_v29 = vadd.f32 %v1190_v22, %v248_v5  ;;  %v1263_v32 = vadd.f32 %v1204_v26, %v297_v19 }
 0x3c0   :  { %v1994_v35 = vmul.f32 -1.442695, %v1223_v29  ;;  %v1996_v38 = vmul.f32 -1.442695, %v1263_v32 }
 0x3c2   :  { %2144 = vpow2.f32 %v1994_v35 }
 0x3c3   :  { %2146 = vpow2.f32 %v1996_v38 }
 0x3c4   :  { %v1218_v24 = vpop.f32.mrf.mxu2 }
 0x3c5   :  { %v1192_v0 = vpop.f32.mrf.mxu0  ;;  %v1206_v8 = vpop.f32.mrf.mxu1  ;;  %v1303_v25 = vadd.f32 %v2934_v31, %v1218_v24 }
 0x3c6   :  { %v1224_v59 = vadd.f32 %v1192_v0, %v250_v48  ;;  %v1264_v15 = vadd.f32 %v1206_v8, %v299_v57 }
 0x3c8   :  { %v2145_v55 = vpop.eup %2144  ;;  %v1995_v43 = vmul.f32 -1.442695, %v1224_v59  ;;  %v1997_v11 = vmul.f32 -1.442695, %v1264_v15 }
 0x3c9   :  { %v2147_v50 = vpop.eup %2146  ;;  %v1231_v40 = vadd.f32 1.0, %v2145_v55 }
 0x3ca   :  { %v1271_v14 = vadd.f32 1.0, %v2147_v50  ;;  %2148 = vpow2.f32 %v1995_v43 }
 0x3cb   :  { %2150 = vrcp.f32 %v1231_v40  ;;  %v1244_v17 = vand.u32 2147483648, %v1231_v40  ;;  %v1242_v54 = vand.u32 2147483647, %v1231_v40  ;;  %vm1238_vm2 = vweird.f32 %v1231_v40 }
 0x3cc   :  { %2152 = vrcp.f32 %v1271_v14  ;;  %v1284_v5 = vand.u32 2147483648, %v1271_v14  ;;  %vm1278_vm6 = vweird.f32 %v1271_v14  ;;  %v1282_v29 = vand.u32 2147483647, %v1271_v14  ;;  %v1220_v47 = vpop.f32.mrf.mxu2 }
 0x3cd   :  { %2154 = vpow2.f32 %v1997_v11  ;;  %v1245_v30 = vor.u32 1.1754944e-38, %v1244_v17  ;;  %vm1243_vm4 = vcmp.eq.f32.partialorder %v1242_v54, 8.507059e+37  ;;  %v1304_v55 = vadd.f32 %v2934_v31, %v1220_v47 }
 0x3ce   :  { %v1285_v57 = vor.u32 1.1754944e-38, %v1284_v5  ;;  %vm1283_vm11 = vcmp.eq.f32.partialorder %v1282_v29, 8.507059e+37  ;;  %v348_v11 = vadd.f32 %v2794_v46, %v2608_v60 }
 0x3d0   :  { %v2149_v53 = vpop.eup %2148 }
 0x3d1   :  { %v2151_v6 = vpop.eup %2150  ;;  %v1232_v20 = vadd.f32 1.0, %v2149_v53 }
 0x3d2   :  { %v2153_v23 = vpop.eup %2152  ;;  %v1234_v16 = vmul.f32 %v2151_v6, %v1231_v40  ;;  %vm1239_vm1 = vweird.f32 %v2151_v6 }
 0x3d3   :  { %v2155_v34 = vpop.eup %2154  ;;  %v1274_v58 = vmul.f32 %v2153_v23, %v1271_v14  ;;  %2156 = vrcp.f32 %v1232_v20  ;;  %vm1240_vm3 = vmor %vm1238_vm2, %vm1239_vm1  ;;  %vm1279_vm5 = vweird.f32 %v2153_v23  ;;  %v1259_v26 = vand.u32 2147483648, %v1232_v20 }
 0x3d4   :  { %v1235_v44 = vsub.f32 1.0, %v1234_v16  ;;  %v2928_v51 = vadd.f32 1.0, %v2155_v34  ;;  %vm2940_vm7 = vmor %vm1278_vm6, %vm1279_vm5  ;;  %v1257_v41 = vand.u32 2147483647, %v1232_v20  ;;  %vm1253_vm9 = vweird.f32 %v1232_v20 }
 0x3d5   :  { %v1275_v9 = vsub.f32 1.0, %v1274_v58  ;;  %v1260_v59 = vor.u32 1.1754944e-38, %v1259_v26 }
 0x3d6   :  { %v1236_v39 = vmul.f32 %v2151_v6, %v1235_v44  ;;  %2158 = vrcp.f32 %v2928_v51  ;;  %vm1258_vm12 = vcmp.eq.f32.partialorder %v1257_v41, 8.507059e+37  ;;  %v1299_v14 = vand.u32 2147483648, %v2928_v51 }
 0x3d7   :  { %v1276_v42 = vmul.f32 %v2153_v23, %v1275_v9  ;;  %vm1293_vm14 = vweird.f32 %v2928_v51 }
 0x3d8   :  { %v1237_v27 = vadd.f32 %v2151_v6, %v1236_v39  ;;  %v1300_v9 = vor.u32 1.1754944e-38, %v1299_v14 }
 0x3d9   :  { %v2157_v1 = vpop.eup %2156  ;;  %v1277_v36 = vadd.f32 %v2153_v23, %v1276_v42 }
 0x3da   :  { %v1241_v2 = vsel %vm1240_vm3, %v2151_v6, %v1237_v27  ;;  %v1249_v62 = vmul.f32 %v2157_v1, %v1232_v20  ;;  %vm1254_vm8 = vweird.f32 %v2157_v1  ;;  %v1297_v6 = vand.u32 2147483647, %v2928_v51 }
 0x3db   :  { %v1246_v13 = vsel %vm1243_vm4, %v1245_v30, %v1241_v2  ;;  %v1281_v4 = vsel %vm2940_vm7, %v2153_v23, %v1277_v36  ;;  %vm1255_vm10 = vmor %vm1253_vm9, %vm1254_vm8 }
 0x3dc   :  { %v2159_v21 = vpop.eup %2158  ;;  %v1305_v10 = vmul.f32 %v1303_v25, %v1246_v13  ;;  %v1250_v19 = vsub.f32 1.0, %v1249_v62  ;;  %v1286_v43 = vsel %vm1283_vm11, %v1285_v57, %v1281_v4  ;;  %vm1298_vm0 = vcmp.eq.f32.partialorder %v1297_v6, 8.507059e+37 }
 0x3dd   :  { %v1289_v22 = vmul.f32 %v2159_v21, %v2928_v51  ;;  %vm1294_vm13 = vweird.f32 %v2159_v21  ;;  %v1311_v20 = vsub.f32 1.0, %v1286_v43  ;;  %v1315_v44 = vmul.f32 %v1286_v43, %v2889_v49  ;;  %v3127_v49 = vld [vmem:[#allocation26_spill] sm:$0xff] }
 0x3de   :  { %v1307_v35 = vadd.f32 %v1305_v10, %v346_v3  ;;  %v1251_v38 = vmul.f32 %v2157_v1, %v1250_v19  ;;  %vm1295_vm15 = vmor %vm1293_vm14, %vm1294_vm13 }
 0x3df   :  { %v1290_v48 = vsub.f32 1.0, %v1289_v22 }
 0x3e0   :  { %2160 = vtanh.f32 %v1307_v35  ;;  %v1252_v0 = vadd.f32 %v2157_v1, %v1251_v38 }
 0x3e1   :  { %v1291_v8 = vmul.f32 %v2159_v21, %v1290_v48 }
 0x3e2   :  { %v1256_v15 = vsel %vm1255_vm10, %v2157_v1, %v1252_v0 }
 0x3e3   :  { %v1261_v50 = vsel %vm1258_vm12, %v1260_v59, %v1256_v15  ;;  %v1292_v40 = vadd.f32 %v2159_v21, %v1291_v8 }
 0x3e4   :  { %v1306_v53 = vmul.f32 %v1304_v55, %v1261_v50 }
 0x3e5   :  { %v1296_v34 = vsel %vm1295_vm15, %v2159_v21, %v1292_v40  ;;  %v3130_v21 = vld [vmem:[#allocation23_spill] sm:$0xff] }
 0x3e6   :  { %v2161_v23 = vpop.eup %2160  ;;  %v1308_v16 = vadd.f32 %v1306_v53, %v348_v11  ;;  %v1301_v46 = vsel %vm1298_vm0, %v1300_v9, %v1296_v34  ;;  %v255_v3 = vadd.f32 %v3130_v21, %v2570_v45 }
 0x3e7   :  { %v1313_v58 = vmul.f32 %v2161_v23, %v1311_v20  ;;  %v1312_v17 = vsub.f32 1.0, %v1301_v46  ;;  %v1316_v42 = vmul.f32 %v1301_v46, %v2892_v52  ;;  %v302_v52 = vadd.f32 %v3127_v49, %v2578_v61 }
 0x3e8   :  { %2162 = vtanh.f32 %v1308_v16 }
 0x3e9   :  { %v2953_v24 = vadd.f32 %v1315_v44, %v1313_v58  ;;  %v3131_v44 = vld [vmem:[#allocation35_spill] sm:$0xff] }
 0x3ea   :  { %v351_v9 = vadd.f32 %v3131_v44, %v2608_v60 }
 0x3ee   :  { %v2163_v39 = vpop.eup %2162 }
 0x3ef   :  { %v1314_v54 = vmul.f32 %v2163_v39, %v1312_v17 }
 0x3f1   :  { %v2956_v51 = vadd.f32 %v1316_v42, %v1314_v54 }
 0x3f3   :  { %v1328_v27 = vpack.c.bf16 %v2956_v51, %v2953_v24 }
 0x3f5   :  { %1337 = vmatmul.bf16.vlgmr.msra.gmra.mxu3 %v1328_v27  ;;  %1351 = vmatmul.bf16.vlgmr.msra.gmra.mxu0 %v1328_v27 }
 0x3f6   :  { %1365 = vmatmul.bf16.vlgmr.msra.gmra.mxu1 %v1328_v27  ;;  %1653 = vmatpush.bf16.msra.mxu3 %v2451_v56 }
 0x3fa   :  { %1654 = vmatpush.bf16.msra.mxu3 %v2459_v63  ;;  %v3128_v63 = vld [vmem:[#allocation21_spill] sm:$0xff] }
 0x3fb   :  { %v253_v2 = vadd.f32 %v3128_v63, %v2570_v45 }
 0x3fe   :  { %1655 = vmatpush.bf16.msra.mxu3 %v2468_v7 }
 0x402   :  { %1656 = vmatpush.bf16.msra.mxu3 %v2475_v12  ;;  %v3129_v12 = vld [vmem:[#allocation28_spill] sm:$0xff] }
 0x406   :  { %1657 = vmatpush.bf16.msra.mxu3 %v2480_v18  ;;  %v304_v18 = vadd.f32 %v3129_v12, %v2578_v61 }
 0x40a   :  { %1658 = vmatpush.bf16.msra.mxu3 %v2485_v28 }
 0x40e   :  { %1659 = vmatpush.bf16.msra.mxu3 %v2493_v33 }
 0x412   :  { %1660 = vmatpush.bf16.msra.mxu3 %v2499_v37 }
 0x472   :  { %v1352_v1 = vpop.f32.mrf.mxu0 }
 0x473   :  { %v1411_v30 = vadd.f32 %v1352_v1, %v302_v52  ;;  %v1366_v59 = vpop.f32.mrf.mxu1 }
 0x474   :  { %v1451_v6 = vadd.f32 %v2934_v31, %v1366_v59  ;;  %v3136_v59 = vld [vmem:[#allocation30_spill] sm:$0xff] }
 0x475   :  { %v2000_v56 = vmul.f32 -1.442695, %v1411_v30 }
 0x477   :  { %2164 = vpow2.f32 %v2000_v56 }
 0x478   :  { %v1338_v7 = vpop.f32.mrf.mxu3 }
 0x479   :  { %v1371_v25 = vadd.f32 %v1338_v7, %v253_v2 }
 0x47a   :  { %v1354_v28 = vpop.f32.mrf.mxu0 }
 0x47b   :  { %v1998_v62 = vmul.f32 -1.442695, %v1371_v25  ;;  %v1412_v33 = vadd.f32 %v1354_v28, %v304_v18  ;;  %v1368_v56 = vpop.f32.mrf.mxu1 }
 0x47c   :  { %v1452_v18 = vadd.f32 %v2934_v31, %v1368_v56 }
 0x47d   :  { %v2165_v13 = vpop.eup %2164  ;;  %2166 = vpow2.f32 %v1998_v62  ;;  %v2001_v37 = vmul.f32 -1.442695, %v1412_v33 }
 0x47e   :  { %v2974_v36 = vadd.f32 1.0, %v2165_v13  ;;  %v3134_v13 = vld [vmem:[#allocation36_spill] sm:$0xff] }
 0x47f   :  { %2168 = vpow2.f32 %v2001_v37  ;;  %v353_v37 = vadd.f32 %v3134_v13, %v2608_v60 }
 0x480   :  { %v1340_v5 = vpop.f32.mrf.mxu3  ;;  %2170 = vrcp.f32 %v2974_v36  ;;  %v1432_v46 = vand.u32 2147483648, %v2974_v36  ;;  %vm1426_vm6 = vweird.f32 %v2974_v36  ;;  %v1430_v42 = vand.u32 2147483647, %v2974_v36 }
 0x481   :  { %v1372_v10 = vadd.f32 %v1340_v5, %v255_v3 }
 0x482   :  { %v1433_v2 = vor.u32 1.1754944e-38, %v1432_v46  ;;  %vm1431_vm11 = vcmp.eq.f32.partialorder %v1430_v42, 8.507059e+37 }
 0x483   :  { %v2167_v19 = vpop.eup %2166  ;;  %v1999_v22 = vmul.f32 -1.442695, %v1372_v10 }
 0x484   :  { %v1379_v26 = vadd.f32 1.0, %v2167_v19 }
 0x485   :  { %v2169_v29 = vpop.eup %2168  ;;  %2172 = vpow2.f32 %v1999_v22 }
 0x486   :  { %2174 = vrcp.f32 %v1379_v26  ;;  %v2171_v32 = vpop.eup %2170  ;;  %v2979_v35 = vadd.f32 1.0, %v2169_v29  ;;  %v1392_v15 = vand.u32 2147483648, %v1379_v26  ;;  %v1390_v43 = vand.u32 2147483647, %v1379_v26 }
 0x487   :  { %v1422_v38 = vmul.f32 %v2171_v32, %v2974_v36  ;;  %vm1386_vm2 = vweird.f32 %v1379_v26  ;;  %vm1427_vm5 = vweird.f32 %v2171_v32 }
 0x488   :  { %2176 = vrcp.f32 %v2979_v35  ;;  %v1393_v53 = vor.u32 1.1754944e-38, %v1392_v15  ;;  %vm1391_vm4 = vcmp.eq.f32.partialorder %v1390_v43, 8.507059e+37  ;;  %vm2993_vm7 = vmor %vm1426_vm6, %vm1427_vm5  ;;  %v1447_v36 = vand.u32 2147483648, %v2979_v35 }
 0x489   :  { %v1423_v57 = vsub.f32 1.0, %v1422_v38  ;;  %vm1441_vm14 = vweird.f32 %v2979_v35  ;;  %v1445_v3 = vand.u32 2147483647, %v2979_v35  ;;  %v307_v15 = vadd.f32 %v3136_v59, %v2578_v61 }
 0x48b   :  { %v2173_v41 = vpop.eup %2172  ;;  %v1424_v50 = vmul.f32 %v2171_v32, %v1423_v57  ;;  %vm1446_vm0 = vcmp.eq.f32.partialorder %v1445_v3, 8.507059e+37 }
 0x48c   :  { %v2175_v48 = vpop.eup %2174  ;;  %v1380_v47 = vadd.f32 1.0, %v2173_v41 }
 0x48d   :  { %v1382_v4 = vmul.f32 %v2175_v48, %v1379_v26  ;;  %vm1387_vm1 = vweird.f32 %v2175_v48  ;;  %v1425_v58 = vadd.f32 %v2171_v32, %v1424_v50 }
 0x48e   :  { %2178 = vrcp.f32 %v1380_v47  ;;  %v2983_v0 = vpop.eup %2176  ;;  %vm1388_vm3 = vmor %vm1386_vm2, %vm1387_vm1  ;;  %v1407_v54 = vand.u32 2147483648, %v1380_v47  ;;  %v1405_v52 = vand.u32 2147483647, %v1380_v47  ;;  %vm1401_vm9 = vweird.f32 %v1380_v47 }
 0x48f   :  { %v1383_v8 = vsub.f32 1.0, %v1382_v4  ;;  %v1437_v40 = vmul.f32 %v2983_v0, %v2979_v35  ;;  %v1429_v63 = vsel %vm2993_vm7, %v2171_v32, %v1425_v58  ;;  %vm1442_vm13 = vweird.f32 %v2983_v0 }
 0x490   :  { %v1408_v12 = vor.u32 1.1754944e-38, %v1407_v54  ;;  %vm1406_vm12 = vcmp.eq.f32.partialorder %v1405_v52, 8.507059e+37  ;;  %v1434_v28 = vsel %vm1431_vm11, %v1433_v2, %v1429_v63  ;;  %vm1443_vm15 = vmor %vm1441_vm14, %vm1442_vm13  ;;  %v1448_v32 = vor.u32 1.1754944e-38, %v1447_v36 }
 0x491   :  { %v1384_v55 = vmul.f32 %v2175_v48, %v1383_v8  ;;  %v1438_v34 = vsub.f32 1.0, %v1437_v40  ;;  %v1459_v5 = vsub.f32 1.0, %v1434_v28  ;;  %v1463_v29 = vmul.f32 %v1434_v28, %v2953_v24  ;;  %v3135_v24 = vld [vmem:[#allocation25_spill] sm:$0xff] }
 0x493   :  { %v1385_v11 = vadd.f32 %v2175_v48, %v1384_v55  ;;  %v1439_v30 = vmul.f32 %v2983_v0, %v1438_v34 }
 0x494   :  { %v2179_v14 = vpop.eup %2178 }
 0x495   :  { %v1389_v20 = vsel %vm1388_vm3, %v2175_v48, %v1385_v11  ;;  %v1397_v23 = vmul.f32 %v2179_v14, %v1380_v47  ;;  %vm1402_vm8 = vweird.f32 %v2179_v14  ;;  %v1440_v33 = vadd.f32 %v2983_v0, %v1439_v30 }
 0x496   :  { %v1394_v16 = vsel %vm1391_vm4, %v1393_v53, %v1389_v20  ;;  %vm1403_vm10 = vmor %vm1401_vm9, %vm1402_vm8 }
 0x497   :  { %v1453_v17 = vmul.f32 %v1451_v6, %v1394_v16  ;;  %v1398_v39 = vsub.f32 1.0, %v1397_v23  ;;  %v1444_v22 = vsel %vm1443_vm15, %v2983_v0, %v1440_v33  ;;  %v258_v0 = vadd.f32 %v3135_v24, %v2570_v45  ;;  %v3138_v6 = vld [vmem:[#allocation32_spill] sm:$0xff] }
 0x498   :  { %v1449_v41 = vsel %vm1446_vm0, %v1448_v32, %v1444_v22  ;;  %v309_v20 = vadd.f32 %v3138_v6, %v2578_v61  ;;  %v3139_v22 = vld [vmem:[#allocation37_spill] sm:$0xff] }
 0x499   :  { %v1399_v49 = vmul.f32 %v2179_v14, %v1398_v39  ;;  %v1455_v1 = vadd.f32 %v1453_v17, %v351_v9  ;;  %v1460_v48 = vsub.f32 1.0, %v1449_v41  ;;  %v1464_v35 = vmul.f32 %v1449_v41, %v2956_v51 }
 0x49b   :  { %v1400_v7 = vadd.f32 %v2179_v14, %v1399_v49  ;;  %2180 = vtanh.f32 %v1455_v1 }
 0x49d   :  { %v1404_v25 = vsel %vm1403_vm10, %v2179_v14, %v1400_v7  ;;  %v3137_v14 = vld [vmem:[#allocation27_spill] sm:$0xff] }
 0x49e   :  { %v1409_v62 = vsel %vm1406_vm12, %v1408_v12, %v1404_v25  ;;  %v260_v53 = vadd.f32 %v3137_v14, %v2570_v45 }
 0x49f   :  { %v1454_v21 = vmul.f32 %v1452_v18, %v1409_v62 }
 0x4a1   :  { %v2181_v10 = vpop.eup %2180  ;;  %v1456_v19 = vadd.f32 %v1454_v21, %v353_v37 }
 0x4a2   :  { %v1461_v26 = vmul.f32 %v2181_v10, %v1459_v5 }
 0x4a3   :  { %2182 = vtanh.f32 %v1456_v19 }
 0x4a4   :  { %v3010_v38 = vadd.f32 %v1463_v29, %v1461_v26  ;;  %v356_v26 = vadd.f32 %v3139_v22, %v2608_v60 }
 0x4a9   :  { %v2183_v47 = vpop.eup %2182 }
 0x4aa   :  { %v1462_v4 = vmul.f32 %v2183_v47, %v1460_v48 }
 0x4ac   :  { %v3013_v57 = vadd.f32 %v1464_v35, %v1462_v4 }
 0x4ae   :  { %v1476_v8 = vpack.c.bf16 %v3013_v57, %v3010_v38 }
 0x4b0   :  { %1485 = vmatmul.bf16.vlgmr.msra.gmra.mxu2 %v1476_v8  ;;  %1499 = vmatmul.bf16.vlgmr.msrb.gmra.mxu3 %v1476_v8 }
 0x4b1   :  { %1513 = vmatmul.bf16.vlgmr.msrb.gmra.mxu0 %v1476_v8 }
 0x52e   :  { %v1514_v7 = vpop.f32.mrf.mxu0 }
 0x52f   :  { %v1599_v36 = vadd.f32 %v2934_v31, %v1514_v7 }
 0x533   :  { %v1486_v55 = vpop.f32.mrf.mxu2  ;;  %v1500_v43 = vpop.f32.mrf.mxu3 }
 0x534   :  { %v1519_v50 = vadd.f32 %v1486_v55, %v258_v0  ;;  %v1559_v40 = vadd.f32 %v1500_v43, %v307_v15 }
 0x536   :  { %v2002_v11 = vmul.f32 -1.442695, %v1519_v50  ;;  %v2004_v51 = vmul.f32 -1.442695, %v1559_v40  ;;  %v1516_v15 = vpop.f32.mrf.mxu0 }
 0x538   :  { %2184 = vpow2.f32 %v2002_v11 }
 0x539   :  { %2186 = vpow2.f32 %v2004_v51  ;;  %v1600_v51 = vadd.f32 %v2934_v31, %v1516_v15 }
 0x53b   :  { %v1488_v23 = vpop.f32.mrf.mxu2  ;;  %v1502_v16 = vpop.f32.mrf.mxu3 }
 0x53c   :  { %v1520_v34 = vadd.f32 %v1488_v23, %v260_v53  ;;  %v1560_v58 = vadd.f32 %v1502_v16, %v309_v20  ;;  %v3142_v23 = vld [vmem:[#allocation38_spill] sm:$0xff] }
 0x53d   :  { %v358_v16 = vadd.f32 %v3142_v23, %v2608_v60 }
 0x53e   :  { %v2185_v44 = vpop.eup %2184  ;;  %v2003_v9 = vmul.f32 -1.442695, %v1520_v34  ;;  %v2005_v39 = vmul.f32 -1.442695, %v1560_v58 }
 0x53f   :  { %v2187_v46 = vpop.eup %2186  ;;  %v1527_v17 = vadd.f32 1.0, %v2185_v44 }
 0x540   :  { %v1567_v54 = vadd.f32 1.0, %v2187_v46  ;;  %2188 = vpow2.f32 %v2003_v9 }
 0x541   :  { %2190 = vrcp.f32 %v1527_v17  ;;  %v1540_v12 = vand.u32 2147483648, %v1527_v17  ;;  %v1538_v28 = vand.u32 2147483647, %v1527_v17  ;;  %vm1534_vm2 = vweird.f32 %v1527_v17 }
 0x542   :  { %2192 = vrcp.f32 %v1567_v54  ;;  %v1580_v32 = vand.u32 2147483648, %v1567_v54  ;;  %vm1574_vm6 = vweird.f32 %v1567_v54  ;;  %v1578_v48 = vand.u32 2147483647, %v1567_v54 }
 0x543   :  { %2194 = vpow2.f32 %v2005_v39  ;;  %v1541_v37 = vor.u32 1.1754944e-38, %v1540_v12  ;;  %vm1539_vm4 = vcmp.eq.f32.partialorder %v1538_v28, 8.507059e+37 }
 0x544   :  { %v1581_v43 = vor.u32 1.1754944e-38, %v1580_v32  ;;  %vm1579_vm10 = vcmp.eq.f32.partialorder %v1578_v48, 8.507059e+37 }
 0x546   :  { %v2189_v42 = vpop.eup %2188 }
 0x547   :  { %v2191_v27 = vpop.eup %2190  ;;  %v1528_v49 = vadd.f32 1.0, %v2189_v42 }
 0x548   :  { %v2193_v52 = vpop.eup %2192  ;;  %v1530_v1 = vmul.f32 %v2191_v27, %v1527_v17  ;;  %vm1535_vm1 = vweird.f32 %v2191_v27 }
 0x549   :  { %v2195_v30 = vpop.eup %2194  ;;  %v1570_v56 = vmul.f32 %v2193_v52, %v1567_v54  ;;  %2196 = vrcp.f32 %v1528_v49  ;;  %vm1536_vm3 = vmor %vm1534_vm2, %vm1535_vm1  ;;  %vm1575_vm5 = vweird.f32 %v2193_v52  ;;  %v1555_v47 = vand.u32 2147483648, %v1528_v49 }
 0x54a   :  { %v1531_v63 = vsub.f32 1.0, %v1530_v1  ;;  %v3025_v2 = vadd.f32 1.0, %v2195_v30  ;;  %vm3032_vm7 = vmor %vm1574_vm6, %vm1575_vm5  ;;  %v1553_v0 = vand.u32 2147483647, %v1528_v49  ;;  %vm1549_vm9 = vweird.f32 %v1528_v49 }
 0x54b   :  { %v1571_v18 = vsub.f32 1.0, %v1570_v56  ;;  %v1556_v40 = vor.u32 1.1754944e-38, %v1555_v47 }
 0x54c   :  { %v1532_v25 = vmul.f32 %v2191_v27, %v1531_v63  ;;  %2198 = vrcp.f32 %v3025_v2  ;;  %vm1554_vm12 = vcmp.eq.f32.partialorder %v1553_v0, 8.507059e+37  ;;  %v1595_v58 = vand.u32 2147483648, %v3025_v2 }
 0x54d   :  { %v1572_v62 = vmul.f32 %v2193_v52, %v1571_v18  ;;  %vm1589_vm14 = vweird.f32 %v3025_v2  ;;  %v1593_v44 = vand.u32 2147483647, %v3025_v2 }
 0x54e   :  { %v1533_v33 = vadd.f32 %v2191_v27, %v1532_v25 }
 0x54f   :  { %v2197_v13 = vpop.eup %2196  ;;  %v1573_v10 = vadd.f32 %v2193_v52, %v1572_v62  ;;  %vm1594_vm0 = vcmp.eq.f32.partialorder %v1593_v44, 8.507059e+37  ;;  %v3144_v62 = vld [vmem:[#allocation33_spill] sm:$0xff] }
 0x550   :  { %v1537_v21 = vsel %vm1536_vm3, %v2191_v27, %v1533_v33  ;;  %v1545_v3 = vmul.f32 %v2197_v13, %v1528_v49  ;;  %vm1550_vm8 = vweird.f32 %v2197_v13  ;;  %v1596_v27 = vor.u32 1.1754944e-38, %v1595_v58 }
 0x551   :  { %v1542_v5 = vsel %vm1539_vm4, %v1541_v37, %v1537_v21  ;;  %v1577_v59 = vsel %vm3032_vm7, %v2193_v52, %v1573_v10  ;;  %vm1551_vm11 = vmor %vm1549_vm9, %vm1550_vm8  ;;  %v312_v33 = vadd.f32 %v3144_v62, %v2578_v61 }
 0x552   :  { %v2199_v19 = vpop.eup %2198  ;;  %v1601_v29 = vmul.f32 %v1599_v36, %v1542_v5  ;;  %v1546_v41 = vsub.f32 1.0, %v1545_v3  ;;  %v1582_v53 = vsel %vm1579_vm10, %v1581_v43, %v1577_v59 }
 0x553   :  { %v1585_v4 = vmul.f32 %v2199_v19, %v3025_v2  ;;  %vm1590_vm13 = vweird.f32 %v2199_v19  ;;  %v1607_v9 = vsub.f32 1.0, %v1582_v53  ;;  %v1611_v42 = vmul.f32 %v1582_v53, %v3010_v38  ;;  %v3143_v38 = vld [vmem:[#allocation29_spill] sm:$0xff] }
 0x554   :  { %v1603_v35 = vadd.f32 %v1601_v29, %v356_v26  ;;  %v1547_v24 = vmul.f32 %v2197_v13, %v1546_v41  ;;  %vm1591_vm15 = vmor %vm1589_vm14, %vm1590_vm13  ;;  %v263_v12 = vadd.f32 %v3143_v38, %v2570_v45  ;;  %v3146_v26 = vld [vmem:[#allocation34_spill] sm:$0xff] }
 0x555   :  { %v1586_v55 = vsub.f32 1.0, %v1585_v4  ;;  %v314_v29 = vadd.f32 %v3146_v26, %v2578_v61 }
 0x556   :  { %2200 = vtanh.f32 %v1603_v35  ;;  %v1548_v50 = vadd.f32 %v2197_v13, %v1547_v24 }
 0x557   :  { %v1587_v11 = vmul.f32 %v2199_v19, %v1586_v55 }
 0x558   :  { %v1552_v14 = vsel %vm1551_vm11, %v2197_v13, %v1548_v50 }
 0x559   :  { %v1557_v6 = vsel %vm1554_vm12, %v1556_v40, %v1552_v14  ;;  %v1588_v20 = vadd.f32 %v2199_v19, %v1587_v11 }
 0x55a   :  { %v1602_v34 = vmul.f32 %v1600_v51, %v1557_v6 }
 0x55b   :  { %v1592_v39 = vsel %vm1591_vm15, %v2199_v19, %v1588_v20 }
 0x55c   :  { %v2201_v46 = vpop.eup %2200  ;;  %v1604_v17 = vadd.f32 %v1602_v34, %v358_v16  ;;  %v1597_v52 = vsel %vm1594_vm0, %v1596_v27, %v1592_v39  ;;  %v3147_v34 = vld [vmem:[#allocation39_spill] sm:$0xff] }
 0x55d   :  { %v1609_v54 = vmul.f32 %v2201_v46, %v1607_v9  ;;  %v1608_v1 = vsub.f32 1.0, %v1597_v52  ;;  %v1612_v63 = vmul.f32 %v1597_v52, %v3013_v57  ;;  %v3145_v57 = vld [vmem:[#allocation31_spill] sm:$0xff]  ;;  %v361_v58 = vadd.f32 %v3147_v34, %v2608_v60 }
 0x55e   :  { %2202 = vtanh.f32 %v1604_v17  ;;  %v265_v37 = vadd.f32 %v3145_v57, %v2570_v45  ;;  %v3148_v57 = vld [vmem:[#allocation40_spill] sm:$0xff] }
 0x55f   :  { %v3045_v49 = vadd.f32 %v1611_v42, %v1609_v54 }
 0x564   :  { %v2203_v30 = vpop.eup %2202 }
 0x565   :  { %v1610_v56 = vmul.f32 %v2203_v30, %v1608_v1 }
 0x567   :  { %v3048_v2 = vadd.f32 %v1612_v63, %v1610_v56 }
 0x569   :  { %v1624_v7 = vpack.c.bf16 %v3048_v2, %v3045_v49 }
 0x56b   :  { %1633 = vmatmul.bf16.vlgmr.msrb.gmra.mxu1 %v1624_v7  ;;  %1647 = vmatmul.bf16.vlgmr.msrb.gmra.mxu2 %v1624_v7 }
 0x56c   :  { %1661 = vmatmul.bf16.vlgmr.msra.gmra.mxu3 %v1624_v7 }
 0x5e8   :  { %v1634_v18 = vpop.f32.mrf.mxu1 }
 0x5e9   :  { %v1667_v25 = vadd.f32 %v1634_v18, %v263_v12 }
 0x5eb   :  { %v2006_v28 = vmul.f32 -1.442695, %v1667_v25 }
 0x5ed   :  { %2204 = vpow2.f32 %v2006_v28 }
 0x5ee   :  { %v1648_v13 = vpop.f32.mrf.mxu2 }
 0x5ef   :  { %v1707_v36 = vadd.f32 %v1648_v13, %v312_v33  ;;  %v1662_v0 = vpop.f32.mrf.mxu3 }
 0x5f0   :  { %v1636_v21 = vpop.f32.mrf.mxu1  ;;  %v1747_v6 = vadd.f32 %v2934_v31, %v1662_v0 }
 0x5f1   :  { %v2008_v3 = vmul.f32 -1.442695, %v1707_v36  ;;  %v1668_v5 = vadd.f32 %v1636_v21, %v265_v37  ;;  %v363_v37 = vadd.f32 %v3148_v57, %v2608_v60 }
 0x5f3   :  { %v2205_v10 = vpop.eup %2204  ;;  %2206 = vpow2.f32 %v2008_v3  ;;  %v2007_v19 = vmul.f32 -1.442695, %v1668_v5 }
 0x5f4   :  { %v1675_v22 = vadd.f32 1.0, %v2205_v10 }
 0x5f5   :  { %2208 = vpow2.f32 %v2007_v19 }
 0x5f6   :  { %2210 = vrcp.f32 %v1675_v22  ;;  %v1650_v32 = vpop.f32.mrf.mxu2  ;;  %v1688_v15 = vand.u32 2147483648, %v1675_v22  ;;  %v1686_v61 = vand.u32 2147483647, %v1675_v22  ;;  %vm1682_vm2 = vweird.f32 %v1675_v22 }
 0x5f7   :  { %v1708_v41 = vadd.f32 %v1650_v32, %v314_v29  ;;  %v1664_v1 = vpop.f32.mrf.mxu3 }
 0x5f8   :  { %v1689_v53 = vor.u32 1.1754944e-38, %v1688_v15  ;;  %vm1687_vm4 = vcmp.eq.f32.partialorder %v1686_v61, 8.507059e+37  ;;  %v1748_v28 = vadd.f32 %v2934_v31, %v1664_v1 }
 0x5f9   :  { %v2207_v48 = vpop.eup %2206  ;;  %v2009_v47 = vmul.f32 -1.442695, %v1708_v41 }
 0x5fa   :  { %v1715_v4 = vadd.f32 1.0, %v2207_v48 }
 0x5fb   :  { %v2209_v35 = vpop.eup %2208  ;;  %2212 = vpow2.f32 %v2009_v47 }
 0x5fc   :  { %v2211_v45 = vpop.eup %2210  ;;  %2214 = vrcp.f32 %v1715_v4  ;;  %v1676_v8 = vadd.f32 1.0, %v2209_v35  ;;  %v1728_v9 = vand.u32 2147483648, %v1715_v4  ;;  %vm1722_vm6 = vweird.f32 %v1715_v4 }
 0x5fd   :  { %v1678_v24 = vmul.f32 %v2211_v45, %v1675_v22  ;;  %vm1683_vm1 = vweird.f32 %v2211_v45  ;;  %v1726_v27 = vand.u32 2147483647, %v1715_v4 }
 0x5fe   :  { %2216 = vrcp.f32 %v1676_v8  ;;  %vm1684_vm3 = vmor %vm1682_vm2, %vm1683_vm1  ;;  %v1701_v54 = vand.u32 2147483647, %v1676_v8  ;;  %v1703_v42 = vand.u32 2147483648, %v1676_v8  ;;  %vm1697_vm8 = vweird.f32 %v1676_v8 }
 0x5ff   :  { %v1679_v59 = vsub.f32 1.0, %v1678_v24  ;;  %v1729_v7 = vor.u32 1.1754944e-38, %v1728_v9  ;;  %vm1727_vm11 = vcmp.eq.f32.partialorder %v1726_v27, 8.507059e+37 }
 0x600   :  { %v1704_v25 = vor.u32 1.1754944e-38, %v1703_v42  ;;  %vm1702_vm12 = vcmp.eq.f32.partialorder %v1701_v54, 8.507059e+37 }
 0x601   :  { %v2213_v55 = vpop.eup %2212  ;;  %v1680_v43 = vmul.f32 %v2211_v45, %v1679_v59 }
 0x602   :  { %v2215_v50 = vpop.eup %2214  ;;  %v3060_v40 = vadd.f32 1.0, %v2213_v55 }
 0x603   :  { %v1718_v11 = vmul.f32 %v2215_v50, %v1715_v4  ;;  %v1681_v51 = vadd.f32 %v2211_v45, %v1680_v43  ;;  %vm1723_vm5 = vweird.f32 %v2215_v50 }
 0x604   :  { %v2217_v14 = vpop.eup %2216  ;;  %2218 = vrcp.f32 %v3060_v40  ;;  %vm1724_vm9 = vmor %vm1722_vm6, %vm1723_vm5  ;;  %v1743_v5 = vand.u32 2147483648, %v3060_v40  ;;  %v1741_v10 = vand.u32 2147483647, %v3060_v40  ;;  %vm1737_vm14 = vweird.f32 %v3060_v40 }
 0x605   :  { %v1719_v20 = vsub.f32 1.0, %v1718_v11  ;;  %v1685_v23 = vsel %vm1684_vm3, %v2211_v45, %v1681_v51  ;;  %v1693_v16 = vmul.f32 %v2217_v14, %v1676_v8  ;;  %vm1698_vm7 = vweird.f32 %v2217_v14 }
 0x606   :  { %v1690_v44 = vsel %vm1687_vm4, %v1689_v53, %v1685_v23  ;;  %vm1699_vm10 = vmor %vm1697_vm8, %vm1698_vm7  ;;  %v1744_v41 = vor.u32 1.1754944e-38, %v1743_v5  ;;  %vm1742_vm0 = vcmp.eq.f32.partialorder %v1741_v10, 8.507059e+37 }
 0x607   :  { %v1720_v46 = vmul.f32 %v2215_v50, %v1719_v20  ;;  %v1749_v17 = vmul.f32 %v1747_v6, %v1690_v44  ;;  %v1694_v39 = vsub.f32 1.0, %v1693_v16 }
 0x609   :  { %v1751_v52 = vadd.f32 %v1749_v17, %v361_v58  ;;  %v1695_v30 = vmul.f32 %v2217_v14, %v1694_v39  ;;  %v1721_v56 = vadd.f32 %v2215_v50, %v1720_v46 }
 0x60a   :  { %v2219_v63 = vpop.eup %2218 }
 0x60b   :  { %2220 = vtanh.f32 %v1751_v52  ;;  %v1733_v38 = vmul.f32 %v2219_v63, %v3060_v40  ;;  %v1696_v12 = vadd.f32 %v2217_v14, %v1695_v30  ;;  %v1725_v18 = vsel %vm1724_vm9, %v2215_v50, %v1721_v56 }
 0x60c   :  { %v1730_v13 = vsel %vm1727_vm11, %v1729_v7, %v1725_v18  ;;  %vm1738_vm13 = vweird.f32 %v2219_v63 }
 0x60d   :  { %v1734_v62 = vsub.f32 1.0, %v1733_v38  ;;  %v1700_v33 = vsel %vm1699_vm10, %v2217_v14, %v1696_v12  ;;  %v1755_v19 = vsub.f32 1.0, %v1730_v13  ;;  %vm1739_vm15 = vmor %vm1737_vm14, %vm1738_vm13  ;;  %v1759_v32 = vmul.f32 %v1730_v13, %v3045_v49 }
 0x60e   :  { %v1705_v36 = vsel %vm1702_vm12, %v1704_v25, %v1700_v33 }
 0x60f   :  { %v1735_v21 = vmul.f32 %v2219_v63, %v1734_v62  ;;  %v1750_v3 = vmul.f32 %v1748_v28, %v1705_v36 }
 0x611   :  { %v2221_v22 = vpop.eup %2220  ;;  %v1752_v31 = vadd.f32 %v1750_v3, %v363_v37  ;;  %v1736_v26 = vadd.f32 %v2219_v63, %v1735_v21 }
 0x612   :  { %v1757_v29 = vmul.f32 %v2221_v22, %v1755_v19 }
 0x613   :  { %2222 = vtanh.f32 %v1752_v31  ;;  %v1740_v60 = vsel %vm1739_vm15, %v2219_v63, %v1736_v26 }
 0x614   :  { %v1761_v48 = vadd.f32 %v1759_v32, %v1757_v29  ;;  %v1745_v47 = vsel %vm1742_vm0, %v1744_v41, %v1740_v60 }
 0x615   :  { %v1756_v4 = vsub.f32 1.0, %v1745_v47  ;;  %v1760_v8 = vmul.f32 %v1745_v47, %v3048_v2 }
 0x619   :  { %v2223_v35 = vpop.eup %2222 }
 0x61a   :  { %v1758_v45 = vmul.f32 %v2223_v35, %v1756_v4 }
 0x61c   :  { %v1762_v24 = vadd.f32 %v1760_v8, %v1758_v45 }
 0x61e   :  { %v2051_v0 = vpack.c.bf16 %v1762_v24, %v1761_v48 }
 0x620   :  { %2052 = vst [vmem:[#allocation12] sm:$0xff] %v2051_v0  }
 0x621   :  { %1786 = dma.vmem_to_hbm [thread:$0]  %s1779_s17, 128, %s1781_s20, [#allocation6], %s2357_s30, %s2357_s30, %s2358_s6  }
 0x622   :  { %2351 = dma.done.wait [#allocation6], 128  }
 0x623   :  { %2352 = vsyncadd [#allocation6], 4294967168 }
 0x624   :  { %1791 = vsyncpa [#allocation5], 1 }
 0x625   :  { %1792 = vsyncpa [#allocation8], 1 }
 0x626   :  { %1793 = vsyncpa [#allocation11], 1 }
 0x627   :  { %1794 = vsyncpa [#allocation6], 1 }

</bundles_post_ra>
